<compile_context>
chip_gen: v7x
topology: tpu7x:2x2x1
jax: 0.10.0
libtpu: 0.0.40
codegen_flags: <defaults>
</compile_context>

<pallas_src>
import math
import functools

import jax
import jax.numpy as jnp
from jax.experimental import pallas as pl
from jax.experimental.pallas import tpu as pltpu


ROUTING_TIMES = 3
# TODO(synk): CoreCapsuleNetwork source is not provided; the routing below follows
# the standard ComiRec/funrec dynamic routing (3 iterations, softmax over seq_len
# including padded positions in the denominator, mask applied to the weighted sum,
# delta computed from the unmasked item_eb_hat, squash n/(1+n)/sqrt(n+1e-9)).


def _round_up(x, m):
    return ((x + m - 1) // m) * m


# ------------------------------------------------------------------
# Kernel 1: ComiCapsuleNetwork (bilinear map + dynamic routing)
#
# Per grid step (one batch block of TB samples), in-kernel layout:
#   x    : (L, TB, D)      sequence embeddings (seq-major: L is the batch dim of
#                          the bilinear matmul -> a single L-batched MXU matmul)
#   mask : (L, TB, 1)      0/1 float padding mask
#   w    : (L, KDp, D)     bilinear weight, bf16, KD padded to KDp (mult of 128),
#                          constant-index BlockSpec -> fetched once, resident
#   P    : (KDp, KDp)      block-diag ones (P[i,j]=1 iff i//D==j//D), bf16.
#                          Lets per-capsule reductions over D ride the MXU and
#                          keeps all routing tensors lane-dense.
#   out  : (TB, KDp)       interest capsules, lane-dense (mult-of-128) store
# Routing logits are stored expanded along D (block-constant per capsule), so
# the softmax over seq_len reduces over the OUTER axis (pure VPU accumulation).
# ------------------------------------------------------------------
def capsule_routing_kernel(x_ref, mask_ref, w_ref, p_ref, out_ref):
    x = x_ref[...]                               # (L, TB, D)  f32
    mask = mask_ref[...]                         # (L, TB, 1)  f32
    w = w_ref[...]                               # (L, KDp, D) bf16
    P = p_ref[...]                               # (KDp, KDp)  bf16
    L, TB, _ = x.shape
    KDp = w.shape[1]

    # item_eb_hat[l, b, kd] = sum_d w[l, kd, d] * x[l, b, d]
    # bf16 operands, f32 MXU accumulation; batched over L -> (L, TB, KDp)
    xb = x.astype(jnp.bfloat16)
    hat = jax.lax.dot_general(
        xb, w,
        dimension_numbers=(((2,), (2,)), ((0,), (0,))),
        preferred_element_type=jnp.float32)      # (L, TB, KDp) f32 (transient)

    # Keep only bf16 copies live: hatb (unmasked, for delta) and hat_zb (masked,
    # for the weighted sum).  Mask is 0/1 so folding it here is exact.
    hatb = hat.astype(jnp.bfloat16)
    hat_zb = (hat * mask).astype(jnp.bfloat16)

    logits = None                                # (L, TB, KDp) f32, expanded along D
    v = None
    inv_L = 1.0 / L

    for it in range(ROUTING_TIMES):
        if it == 0:
            # logits are identically zero -> softmax is uniform 1/L: skip the
            # max/exp/sum/div pass entirely (one third less EUP work).
            z = jnp.sum(hat_zb, axis=0, dtype=jnp.float32) * inv_L    # (TB, KDp)
        else:
            # softmax over seq_len: axis 0 is the outer dim -> VPU max/sum.
            mmax = jnp.max(logits, axis=0, keepdims=True)
            e = jnp.exp(logits - mmax)
            denom = jnp.sum(e, axis=0, keepdims=True)
            wsoft = e * pl.reciprocal(denom, approx=True)             # EUP divide
            z = jnp.sum(wsoft * hat_zb, axis=0)                       # (TB, KDp) f32

        # per-capsule ||z_k||^2, expanded back to KDp lanes via the MXU (P is 0/1,
        # bf16 lossless).
        zz = (z * z).astype(jnp.bfloat16)
        cap_norm = jnp.dot(zz, P, preferred_element_type=jnp.float32)
        scalar = (cap_norm * pl.reciprocal(1.0 + cap_norm, approx=True)
                  * jax.lax.rsqrt(cap_norm + 1e-9))
        v = scalar * z                                                # squash

        if it < ROUTING_TIMES - 1:
            # delta[l, b, k] = sum_d hat[l,b,k,d] * v[b,k,d]   (MXU via P), bf16 in
            hv = hatb * v.astype(jnp.bfloat16)[None]                  # (L, TB, KDp)
            delta = jnp.dot(hv.reshape(L * TB, KDp), P,
                            preferred_element_type=jnp.float32)
            delta = delta.reshape(L, TB, KDp)
            logits = delta if logits is None else logits + delta

    out_ref[...] = v                              # lane-dense (TB, KDp) store


def capsule_forward(seq_emb_lbd, mask_lb, w, interest_num, *, batch_tile=128):
    """seq_emb_lbd: (L, B, D) seq-major embeddings; mask_lb: (L, B)."""
    L, B, D = seq_emb_lbd.shape
    K = interest_num
    KD = K * D
    KDp = _round_up(KD, 128)                     # lane-dense padding of K*D

    tb = min(batch_tile, _round_up(B, 8))        # MXU M-dim tile (<=128, mult of 8)
    B_pad = _round_up(B, tb)

    x = seq_emb_lbd.astype(jnp.float32)
    m = mask_lb.astype(jnp.float32)[:, :, None]                      # (L, B, 1)
    if B_pad != B:
        x = jnp.pad(x, ((0, 0), (0, B_pad - B), (0, 0)))
        m = jnp.pad(m, ((0, 0), (0, B_pad - B), (0, 0)))

    # Bilinear weight: (1, L, KD, D) -> (L, KDp, D), bf16 (parameter, cast once;
    # zero padding of the extra lanes yields zero "virtual capsules" that never
    # mix with real ones through P and are sliced off below).
    w3 = jnp.reshape(w, (L, KD, D))
    if KDp != KD:
        w3 = jnp.pad(w3, ((0, 0), (0, KDp - KD), (0, 0)))
    w3 = w3.astype(jnp.bfloat16)

    # Block-diagonal ones matrix (constant, folded at compile time), bf16 lossless.
    kd_ids = jnp.arange(KDp) // D
    P = (kd_ids[:, None] == kd_ids[None, :]).astype(jnp.bfloat16)    # (KDp, KDp)

    grid_b = B_pad // tb
    flops = (2 * B_pad * L * KDp * D
             + ROUTING_TIMES * 2 * B_pad * KDp * KDp
             + (ROUTING_TIMES - 1) * 2 * B_pad * L * KDp * KDp)
    bytes_accessed = 4 * (x.size + m.size + B_pad * KDp) + 2 * (w3.size + P.size)

    out = pl.pallas_call(
        capsule_routing_kernel,
        out_shape=jax.ShapeDtypeStruct((B_pad, KDp), jnp.float32),
        grid=(grid_b,),
        in_specs=[
            pl.BlockSpec((L, tb, D), lambda i: (0, i, 0)),
            pl.BlockSpec((L, tb, 1), lambda i: (0, i, 0)),
            # Constant index maps: blocks stay resident after the first fetch,
            # no per-step re-DMA, and the batch axis stays "parallel" (both v7x
            # TensorCores usable).
            pl.BlockSpec((L, KDp, D), lambda i: (0, 0, 0)),
            pl.BlockSpec((KDp, KDp), lambda i: (0, 0)),
        ],
        out_specs=pl.BlockSpec((tb, KDp), lambda i: (i, 0)),
        compiler_params=pltpu.CompilerParams(
            dimension_semantics=("parallel",),
            # TODO(synk): re-derive / lower batch_tile for v7x (64 MiB VMEM/TC)
            # at production L / K*D.
            vmem_limit_bytes=48 * 1024 * 1024),
        cost_estimate=pl.CostEstimate(
            flops=int(flops),
            transcendentals=int((ROUTING_TIMES - 1) * B_pad * L * KDp),
            bytes_accessed=int(bytes_accessed)),
    )(x, m, w3, P)

    return out[:B, :KD].reshape(B, K, D)


# ------------------------------------------------------------------
# Kernel 2: fused scoring + cross-entropy reduction
#   scores = user_emb (B, D) @ item_table (N, D)^T, but we never materialize the
#   (B, N) matrix: N is an "arbitrary" accumulation axis with an online
#   logsumexp and a positive-item logit accumulated per row.  Item tiles are
#   streamed as contiguous (tn, D) f32 rows and cast to bf16 in-kernel (no
#   wrapper cast pass); contraction over D on the MXU with f32 accumulation.
# ------------------------------------------------------------------
def score_ce_kernel(u_ref, pos_in_ref, items_ref, logz_ref, pos_out_ref,
                    m_sc, l_sc, *, n_items):
    j = pl.program_id(1)

    @pl.when(j == 0)
    def _init():
        m_sc[...] = jnp.full_like(m_sc, -jnp.inf)
        l_sc[...] = jnp.zeros_like(l_sc)
        pos_out_ref[...] = jnp.zeros_like(pos_out_ref)

    ub = u_ref[...].astype(jnp.bfloat16)                     # (tb, D)
    ib = items_ref[...].astype(jnp.bfloat16)                 # (tn, D), in-kernel cast
    s = jax.lax.dot_general(
        ub, ib,
        dimension_numbers=(((1,), (1,)), ((), ())),          # contract over D
        preferred_element_type=jnp.float32)                  # (tb, tn) f32

    tn = s.shape[1]
    col = j * tn + jax.lax.broadcasted_iota(jnp.int32, (1, tn), 1)   # global item ids
    s = jnp.where(col < n_items, s, -jnp.inf)                # mask N tail padding

    # positive-item logit for this tile (0 if the positive item is elsewhere)
    pos_ids = pos_in_ref[...]                                # (tb, 1) int32
    pmask = col == pos_ids                                   # (tb, tn)
    pos_out_ref[...] += jnp.sum(jnp.where(pmask, s, 0.0), axis=-1, keepdims=True)

    # online logsumexp across N tiles
    m_prev = m_sc[...]
    m_new = jnp.maximum(m_prev, jnp.max(s, axis=-1, keepdims=True))
    l_sc[...] = (l_sc[...] * jnp.exp(m_prev - m_new)
                 + jnp.sum(jnp.exp(s - m_new), axis=-1, keepdims=True))
    m_sc[...] = m_new

    @pl.when(j == pl.num_programs(1) - 1)
    def _finalize():
        logz_ref[...] = m_sc[...] + jnp.log(l_sc[...])


def score_and_logsumexp(user_emb, item_table, pos, *, batch_tile=512, n_tile=1024):
    """Returns (log_z, pos_score), each (B,), for loss = mean(log_z - pos_score)."""
    B, D = user_emb.shape
    N = item_table.shape[0]

    tb = min(batch_tile, _round_up(B, 8))        # big B tile -> item table streamed
    B_pad = _round_up(B, tb)                     # at most ceil(B/tb) times
    tn = n_tile if N >= n_tile else N            # fixed 128-friendly N tile; tail masked
    grid = (B_pad // tb, pl.cdiv(N, tn))

    u = user_emb.astype(jnp.float32)
    p = pos.astype(jnp.int32)[:, None]
    if B_pad != B:
        u = jnp.pad(u, ((0, B_pad - B), (0, 0)))
        p = jnp.pad(p, ((0, B_pad - B), (0, 0)))

    kern = functools.partial(score_ce_kernel, n_items=N)
    logz, pos_score = pl.pallas_call(
        kern,
        out_shape=(jax.ShapeDtypeStruct((B_pad, 1), jnp.float32),
                   jax.ShapeDtypeStruct((B_pad, 1), jnp.float32)),
        grid=grid,
        in_specs=[
            pl.BlockSpec((tb, D), lambda i, j: (i, 0)),
            pl.BlockSpec((tb, 1), lambda i, j: (i, 0)),
            pl.BlockSpec((tn, D), lambda i, j: (j, 0)),
        ],
        out_specs=(pl.BlockSpec((tb, 1), lambda i, j: (i, 0)),
                   pl.BlockSpec((tb, 1), lambda i, j: (i, 0))),
        scratch_shapes=[pltpu.VMEM((tb, 1), jnp.float32),    # running max
                        pltpu.VMEM((tb, 1), jnp.float32)],   # running sum-exp
        compiler_params=pltpu.CompilerParams(
            dimension_semantics=("parallel", "arbitrary"),
            vmem_limit_bytes=48 * 1024 * 1024),
        cost_estimate=pl.CostEstimate(
            flops=int(2 * B_pad * N * D),
            transcendentals=int(B_pad * N),
            bytes_accessed=int(grid[0] * N * D * 4 + B_pad * D * 4 + B_pad * 16)),
    )(u, p, item_table.astype(jnp.float32))

    return logz[:B, 0], pos_score[:B, 0]


# ------------------------------------------------------------------
# Full COMI forward
# ------------------------------------------------------------------
@functools.partial(jax.jit, static_argnames=("interest_num", "train"))
def comi_forward(item_seq, mask, item, item_emb_table, w,
                 interest_num=5, train=True):
    item_seq = item_seq.astype(jnp.int32)
    # Gather directly in seq-major (L, B, D) layout: no extra HBM transpose pass.
    seq_emb_lbd = item_emb_table[item_seq.T]                          # (L, B, D)
    mask_lb = mask.T.astype(jnp.float32)                              # (L, B)

    multi_interest = capsule_forward(seq_emb_lbd, mask_lb, w, interest_num)  # (B,K,D)
    if not train:
        return {"user_emb": multi_interest}

    B = item_seq.shape[0]
    pos = item[:, 0].astype(jnp.int32)                                # (B,)  (.squeeze(1))
    item_e = item_emb_table[pos]                                      # (B, D)
    cos_res = jnp.einsum("bkd,bd->bk", multi_interest, item_e)        # bmm(..., item.unsqueeze(-1))
    k_index = jnp.argmax(cos_res, axis=1)                             # (B,)
    best = jnp.take_along_axis(
        multi_interest, k_index[:, None, None], axis=1)[:, 0, :]      # (B, D) best interest

    # Fused scoring + CE reduction: loss = mean(logsumexp(scores) - scores[pos])
    # (nn.CrossEntropyLoss, mean), without materializing the (B, n_items) matrix.
    log_z, pos_score = score_and_logsumexp(best, item_emb_table, pos)
    loss = jnp.mean(log_z - pos_score)
    return {"user_emb": multi_interest, "loss": loss}


if __name__ == "__main__":
    # small shapes consistent with the module
    B, L, D, K, N = 2, 8, 32, 5, 64   # batch, max_length, embedding_dim, interest_num, n_items

    key = jax.random.PRNGKey(0)
    k_emb, k_w, k_seq, k_item = jax.random.split(key, 4)

    # deterministic kaiming_normal_-style init (std = sqrt(2 / fan_in))
    item_emb_table = jax.random.normal(k_emb, (N, D), jnp.float32) * math.sqrt(2.0 / D)
    w = jax.random.normal(k_w, (1, L, K * D, D), jnp.float32) * math.sqrt(
        2.0 / (L * (K * D) * D))

    item_seq = jax.random.randint(k_seq, (B, L), 1, N)
    item_seq = item_seq.at[0, L - 2:].set(0)           # some padding positions
    mask = (item_seq != 0).astype(jnp.float32)
    item = jax.random.randint(k_item, (B, 1), 1, N)

    out = comi_forward(item_seq, mask, item, item_emb_table, w,
                       interest_num=K, train=True)
    jax.block_until_ready(out["user_emb"])
    jax.block_until_ready(out["loss"])
    assert out["user_emb"].shape == (B, K, D)
    assert out["loss"].shape == ()
    assert bool(jnp.isfinite(out["loss"]))
    print("KERNEL_OK")
</pallas_src>

<mosaic_0001>
module attributes {stable_mosaic.version = 11 : i64} {
  func.func @capsule_routing_kernel(%arg0: i32, %arg1: memref<8x8x32xf32, #tpu.memory_space<vmem>>, %arg2: memref<8x8x1xf32, #tpu.memory_space<vmem>>, %arg3: memref<8x256x32xbf16, #tpu.memory_space<vmem>>, %arg4: memref<256x256xbf16, #tpu.memory_space<vmem>>, %arg5: memref<8x256xf32, #tpu.memory_space<vmem>>) attributes {dimension_semantics = [#tpu.dimension_semantics<parallel>], iteration_bounds = array<i64: 1>, scalar_prefetch = 0 : i64, scratch_operands = 0 : i64, tpu.core_type = #tpu.core_type<tc>, window_params = [{transform_indices = @transform_0, window_bounds = array<i64: 8, 8, 32>}, {transform_indices = @transform_1, window_bounds = array<i64: 8, 8, 1>}, {pipeline_mode = #tpu.pipeline_mode<synchronous>, transform_indices = @transform_2, window_bounds = array<i64: 8, 256, 32>}, {pipeline_mode = #tpu.pipeline_mode<synchronous>, transform_indices = @transform_3, window_bounds = array<i64: 256, 256>}, {transform_indices = @transform_4, window_bounds = array<i64: 8, 256>}]} {
    %c0 = arith.constant 0 : index
    %c0_0 = arith.constant 0 : index
    %c0_1 = arith.constant 0 : index
    %0 = vector.load %arg1[%c0, %c0_0, %c0_1] : memref<8x8x32xf32, #tpu.memory_space<vmem>>, vector<8x8x32xf32>
    %c0_2 = arith.constant 0 : index
    %c0_3 = arith.constant 0 : index
    %c0_4 = arith.constant 0 : index
    %1 = vector.load %arg2[%c0_2, %c0_3, %c0_4] : memref<8x8x1xf32, #tpu.memory_space<vmem>>, vector<8x8x1xf32>
    %c0_5 = arith.constant 0 : index
    %c0_6 = arith.constant 0 : index
    %c0_7 = arith.constant 0 : index
    %2 = vector.load %arg3[%c0_5, %c0_6, %c0_7] : memref<8x256x32xbf16, #tpu.memory_space<vmem>>, vector<8x256x32xbf16>
    %c0_8 = arith.constant 0 : index
    %c0_9 = arith.constant 0 : index
    %3 = vector.load %arg4[%c0_8, %c0_9] : memref<256x256xbf16, #tpu.memory_space<vmem>>, vector<256x256xbf16>
    %4 = arith.truncf %0 : vector<8x8x32xf32> to vector<8x8x32xbf16>
    %cst = arith.constant dense<0.000000e+00> : vector<8x8x256xf32>
    %5 = tpu.matmul %4, %2, %cst {dimension_numbers = #tpu.dot_dimension_numbers<[2], [2], [1], [1], [0, 0, 0, 1, 1, 1], [0], [0]>} : vector<8x8x32xbf16>, vector<8x256x32xbf16>, vector<8x8x256xf32> -> vector<8x8x256xf32>
    %6 = arith.truncf %5 : vector<8x8x256xf32> to vector<8x8x256xbf16>
    %7 = vector.broadcast %1 : vector<8x8x1xf32> to vector<8x8x256xf32>
    %8 = arith.mulf %5, %7 : vector<8x8x256xf32>
    %9 = arith.truncf %8 : vector<8x8x256xf32> to vector<8x8x256xbf16>
    %10 = arith.extf %9 : vector<8x8x256xbf16> to vector<8x8x256xf32>
    %cst_10 = arith.constant dense<0.000000e+00> : vector<8x256xf32>
    %11 = vector.multi_reduction <add>, %10, %cst_10 [0] : vector<8x8x256xf32> to vector<8x256xf32>
    %cst_11 = arith.constant 1.250000e-01 : f32
    %12 = vector.broadcast %cst_11 : f32 to vector<8x256xf32>
    %13 = arith.mulf %11, %12 : vector<8x256xf32>
    %14 = arith.mulf %13, %13 : vector<8x256xf32>
    %15 = arith.truncf %14 : vector<8x256xf32> to vector<8x256xbf16>
    %cst_12 = arith.constant dense<0.000000e+00> : vector<8x256xf32>
    %16 = tpu.matmul %15, %3, %cst_12 {dimension_numbers = #tpu.dot_dimension_numbers<[1], [0], [0], [1], [0, 0, 1, 1], [], []>} : vector<8x256xbf16>, vector<256x256xbf16>, vector<8x256xf32> -> vector<8x256xf32>
    %cst_13 = arith.constant 1.000000e+00 : f32
    %17 = vector.broadcast %cst_13 : f32 to vector<8x256xf32>
    %18 = arith.addf %17, %16 : vector<8x256xf32>
    %19 = tpu.reciprocal %18 {approx = true} : vector<8x256xf32> -> vector<8x256xf32>
    %20 = arith.mulf %16, %19 : vector<8x256xf32>
    %cst_14 = arith.constant 9.99999971E-10 : f32
    %21 = vector.broadcast %cst_14 : f32 to vector<8x256xf32>
    %22 = arith.addf %16, %21 : vector<8x256xf32>
    %23 = math.rsqrt %22 : vector<8x256xf32>
    %24 = arith.mulf %20, %23 : vector<8x256xf32>
    %25 = arith.mulf %24, %13 : vector<8x256xf32>
    %26 = arith.truncf %25 : vector<8x256xf32> to vector<8x256xbf16>
    %27 = vector.shape_cast %26 : vector<8x256xbf16> to vector<1x8x256xbf16>
    %28 = vector.broadcast %27 : vector<1x8x256xbf16> to vector<8x8x256xbf16>
    %29 = arith.mulf %6, %28 : vector<8x8x256xbf16>
    %30 = vector.shape_cast %29 : vector<8x8x256xbf16> to vector<64x256xbf16>
    %cst_15 = arith.constant dense<0.000000e+00> : vector<64x256xf32>
    %31 = tpu.matmul %30, %3, %cst_15 {dimension_numbers = #tpu.dot_dimension_numbers<[1], [0], [0], [1], [0, 0, 1, 1], [], []>} : vector<64x256xbf16>, vector<256x256xbf16>, vector<64x256xf32> -> vector<64x256xf32>
    %32 = vector.shape_cast %31 : vector<64x256xf32> to vector<8x8x256xf32>
    %cst_16 = arith.constant dense<0xFF800000> : vector<8x256xf32>
    %33 = vector.multi_reduction <maximumf>, %32, %cst_16 [0] : vector<8x8x256xf32> to vector<8x256xf32>
    %34 = vector.shape_cast %33 : vector<8x256xf32> to vector<1x8x256xf32>
    %35 = vector.broadcast %34 : vector<1x8x256xf32> to vector<8x8x256xf32>
    %36 = arith.subf %32, %35 : vector<8x8x256xf32>
    %37 = math.exp %36 : vector<8x8x256xf32>
    %cst_17 = arith.constant dense<0.000000e+00> : vector<8x256xf32>
    %38 = vector.multi_reduction <add>, %37, %cst_17 [0] : vector<8x8x256xf32> to vector<8x256xf32>
    %39 = vector.shape_cast %38 : vector<8x256xf32> to vector<1x8x256xf32>
    %40 = tpu.reciprocal %39 {approx = true} : vector<1x8x256xf32> -> vector<1x8x256xf32>
    %41 = vector.broadcast %40 : vector<1x8x256xf32> to vector<8x8x256xf32>
    %42 = arith.mulf %37, %41 : vector<8x8x256xf32>
    %43 = arith.extf %9 : vector<8x8x256xbf16> to vector<8x8x256xf32>
    %44 = arith.mulf %42, %43 : vector<8x8x256xf32>
    %cst_18 = arith.constant dense<0.000000e+00> : vector<8x256xf32>
    %45 = vector.multi_reduction <add>, %44, %cst_18 [0] : vector<8x8x256xf32> to vector<8x256xf32>
    %46 = arith.mulf %45, %45 : vector<8x256xf32>
    %47 = arith.truncf %46 : vector<8x256xf32> to vector<8x256xbf16>
    %cst_19 = arith.constant dense<0.000000e+00> : vector<8x256xf32>
    %48 = tpu.matmul %47, %3, %cst_19 {dimension_numbers = #tpu.dot_dimension_numbers<[1], [0], [0], [1], [0, 0, 1, 1], [], []>} : vector<8x256xbf16>, vector<256x256xbf16>, vector<8x256xf32> -> vector<8x256xf32>
    %cst_20 = arith.constant 1.000000e+00 : f32
    %49 = vector.broadcast %cst_20 : f32 to vector<8x256xf32>
    %50 = arith.addf %49, %48 : vector<8x256xf32>
    %51 = tpu.reciprocal %50 {approx = true} : vector<8x256xf32> -> vector<8x256xf32>
    %52 = arith.mulf %48, %51 : vector<8x256xf32>
    %cst_21 = arith.constant 9.99999971E-10 : f32
    %53 = vector.broadcast %cst_21 : f32 to vector<8x256xf32>
    %54 = arith.addf %48, %53 : vector<8x256xf32>
    %55 = math.rsqrt %54 : vector<8x256xf32>
    %56 = arith.mulf %52, %55 : vector<8x256xf32>
    %57 = arith.mulf %56, %45 : vector<8x256xf32>
    %58 = arith.truncf %57 : vector<8x256xf32> to vector<8x256xbf16>
    %59 = vector.shape_cast %58 : vector<8x256xbf16> to vector<1x8x256xbf16>
    %60 = vector.broadcast %59 : vector<1x8x256xbf16> to vector<8x8x256xbf16>
    %61 = arith.mulf %6, %60 : vector<8x8x256xbf16>
    %62 = vector.shape_cast %61 : vector<8x8x256xbf16> to vector<64x256xbf16>
    %cst_22 = arith.constant dense<0.000000e+00> : vector<64x256xf32>
    %63 = tpu.matmul %62, %3, %cst_22 {dimension_numbers = #tpu.dot_dimension_numbers<[1], [0], [0], [1], [0, 0, 1, 1], [], []>} : vector<64x256xbf16>, vector<256x256xbf16>, vector<64x256xf32> -> vector<64x256xf32>
    %64 = vector.shape_cast %63 : vector<64x256xf32> to vector<8x8x256xf32>
    %65 = arith.addf %32, %64 : vector<8x8x256xf32>
    %cst_23 = arith.constant dense<0xFF800000> : vector<8x256xf32>
    %66 = vector.multi_reduction <maximumf>, %65, %cst_23 [0] : vector<8x8x256xf32> to vector<8x256xf32>
    %67 = vector.shape_cast %66 : vector<8x256xf32> to vector<1x8x256xf32>
    %68 = vector.broadcast %67 : vector<1x8x256xf32> to vector<8x8x256xf32>
    %69 = arith.subf %65, %68 : vector<8x8x256xf32>
    %70 = math.exp %69 : vector<8x8x256xf32>
    %cst_24 = arith.constant dense<0.000000e+00> : vector<8x256xf32>
    %71 = vector.multi_reduction <add>, %70, %cst_24 [0] : vector<8x8x256xf32> to vector<8x256xf32>
    %72 = vector.shape_cast %71 : vector<8x256xf32> to vector<1x8x256xf32>
    %73 = tpu.reciprocal %72 {approx = true} : vector<1x8x256xf32> -> vector<1x8x256xf32>
    %74 = vector.broadcast %73 : vector<1x8x256xf32> to vector<8x8x256xf32>
    %75 = arith.mulf %70, %74 : vector<8x8x256xf32>
    %76 = arith.extf %9 : vector<8x8x256xbf16> to vector<8x8x256xf32>
    %77 = arith.mulf %75, %76 : vector<8x8x256xf32>
    %cst_25 = arith.constant dense<0.000000e+00> : vector<8x256xf32>
    %78 = vector.multi_reduction <add>, %77, %cst_25 [0] : vector<8x8x256xf32> to vector<8x256xf32>
    %79 = arith.mulf %78, %78 : vector<8x256xf32>
    %80 = arith.truncf %79 : vector<8x256xf32> to vector<8x256xbf16>
    %cst_26 = arith.constant dense<0.000000e+00> : vector<8x256xf32>
    %81 = tpu.matmul %80, %3, %cst_26 {dimension_numbers = #tpu.dot_dimension_numbers<[1], [0], [0], [1], [0, 0, 1, 1], [], []>} : vector<8x256xbf16>, vector<256x256xbf16>, vector<8x256xf32> -> vector<8x256xf32>
    %cst_27 = arith.constant 1.000000e+00 : f32
    %82 = vector.broadcast %cst_27 : f32 to vector<8x256xf32>
    %83 = arith.addf %82, %81 : vector<8x256xf32>
    %84 = tpu.reciprocal %83 {approx = true} : vector<8x256xf32> -> vector<8x256xf32>
    %85 = arith.mulf %81, %84 : vector<8x256xf32>
    %cst_28 = arith.constant 9.99999971E-10 : f32
    %86 = vector.broadcast %cst_28 : f32 to vector<8x256xf32>
    %87 = arith.addf %81, %86 : vector<8x256xf32>
    %88 = math.rsqrt %87 : vector<8x256xf32>
    %89 = arith.mulf %85, %88 : vector<8x256xf32>
    %90 = arith.mulf %89, %78 : vector<8x256xf32>
    %c0_29 = arith.constant 0 : index
    %c0_30 = arith.constant 0 : index
    %91 = vector.load %arg5[%c0_29, %c0_30] : memref<8x256xf32, #tpu.memory_space<vmem>>, vector<8x256xf32>
    tpu.vector_store %arg5[%c0_29, %c0_30], %90 {strides = array<i32>} : memref<8x256xf32, #tpu.memory_space<vmem>>, vector<8x256xf32>,
    return
  }
  func.func @transform_0(%arg0: i32) -> (i32, i32, i32) {
    %c0_i32 = arith.constant 0 : i32
    %c0_i32_0 = arith.constant 0 : i32
    %c0_i32_1 = arith.constant 0 : i32
    return %c0_i32, %arg0, %c0_i32_0 : i32, i32, i32
  }
  func.func @transform_1(%arg0: i32) -> (i32, i32, i32) {
    %c0_i32 = arith.constant 0 : i32
    %c0_i32_0 = arith.constant 0 : i32
    %c0_i32_1 = arith.constant 0 : i32
    return %c0_i32, %arg0, %c0_i32_0 : i32, i32, i32
  }
  func.func @transform_2(%arg0: i32) -> (i32, i32, i32) {
    %c0_i32 = arith.constant 0 : i32
    %c0_i32_0 = arith.constant 0 : i32
    %c0_i32_1 = arith.constant 0 : i32
    %c0_i32_2 = arith.constant 0 : i32
    return %c0_i32, %c0_i32_0, %c0_i32_1 : i32, i32, i32
  }
  func.func @transform_3(%arg0: i32) -> (i32, i32) {
    %c0_i32 = arith.constant 0 : i32
    %c0_i32_0 = arith.constant 0 : i32
    %c0_i32_1 = arith.constant 0 : i32
    return %c0_i32, %c0_i32_0 : i32, i32
  }
  func.func @transform_4(%arg0: i32) -> (i32, i32) {
    %c0_i32 = arith.constant 0 : i32
    %c0_i32_0 = arith.constant 0 : i32
    return %arg0, %c0_i32 : i32, i32
  }
}

module attributes {stable_mosaic.version = 11 : i64} {
  func.func @score_ce_kernel(%arg0: i32, %arg1: i32, %arg2: memref<8x32xf32, #tpu.memory_space<vmem>>, %arg3: memref<8x1xi32, #tpu.memory_space<vmem>>, %arg4: memref<64x32xf32, #tpu.memory_space<vmem>>, %arg5: memref<8x1xf32, #tpu.memory_space<vmem>>, %arg6: memref<8x1xf32, #tpu.memory_space<vmem>>, %arg7: memref<8x1xf32, #tpu.memory_space<vmem>>, %arg8: memref<8x1xf32, #tpu.memory_space<vmem>>) attributes {dimension_semantics = [#tpu.dimension_semantics<parallel>, #tpu.dimension_semantics<arbitrary>], iteration_bounds = array<i64: 1, 1>, scalar_prefetch = 0 : i64, scratch_operands = 2 : i64, tpu.core_type = #tpu.core_type<tc>, window_params = [{transform_indices = @transform_0, window_bounds = array<i64: 8, 32>}, {transform_indices = @transform_1, window_bounds = array<i64: 8, 1>}, {transform_indices = @transform_2, window_bounds = array<i64: 64, 32>}, {transform_indices = @transform_3, window_bounds = array<i64: 8, 1>}, {transform_indices = @transform_4, window_bounds = array<i64: 8, 1>}]} {
    %c0_i32 = arith.constant 0 : i32
    %0 = arith.cmpi eq, %arg1, %c0_i32 : i32
    %1 = arith.extui %0 : i1 to i32
    %c0_i32_0 = arith.constant 0 : i32
    %2 = arith.cmpi ne, %1, %c0_i32_0 : i32
    scf.if %2 {
      %cst_26 = arith.constant 0xFF800000 : f32
      %48 = vector.broadcast %cst_26 : f32 to vector<8x1xf32>
      %c0_27 = arith.constant 0 : index
      %c0_28 = arith.constant 0 : index
      %49 = vector.load %arg7[%c0_27, %c0_28] : memref<8x1xf32, #tpu.memory_space<vmem>>, vector<8x1xf32>
      tpu.vector_store %arg7[%c0_27, %c0_28], %48 {strides = array<i32>} : memref<8x1xf32, #tpu.memory_space<vmem>>, vector<8x1xf32>,
      %cst_29 = arith.constant 0.000000e+00 : f32
      %50 = vector.broadcast %cst_29 : f32 to vector<8x1xf32>
      %c0_30 = arith.constant 0 : index
      %c0_31 = arith.constant 0 : index
      %51 = vector.load %arg8[%c0_30, %c0_31] : memref<8x1xf32, #tpu.memory_space<vmem>>, vector<8x1xf32>
      tpu.vector_store %arg8[%c0_30, %c0_31], %50 {strides = array<i32>} : memref<8x1xf32, #tpu.memory_space<vmem>>, vector<8x1xf32>,
      %cst_32 = arith.constant 0.000000e+00 : f32
      %52 = vector.broadcast %cst_32 : f32 to vector<8x1xf32>
      %c0_33 = arith.constant 0 : index
      %c0_34 = arith.constant 0 : index
      %53 = vector.load %arg6[%c0_33, %c0_34] : memref<8x1xf32, #tpu.memory_space<vmem>>, vector<8x1xf32>
      tpu.vector_store %arg6[%c0_33, %c0_34], %52 {strides = array<i32>} : memref<8x1xf32, #tpu.memory_space<vmem>>, vector<8x1xf32>,
    } else {
    }
    %c0 = arith.constant 0 : index
    %c0_1 = arith.constant 0 : index
    %3 = vector.load %arg2[%c0, %c0_1] : memref<8x32xf32, #tpu.memory_space<vmem>>, vector<8x32xf32>
    %4 = arith.truncf %3 : vector<8x32xf32> to vector<8x32xbf16>
    %c0_2 = arith.constant 0 : index
    %c0_3 = arith.constant 0 : index
    %5 = vector.load %arg4[%c0_2, %c0_3] : memref<64x32xf32, #tpu.memory_space<vmem>>, vector<64x32xf32>
    %6 = arith.truncf %5 : vector<64x32xf32> to vector<64x32xbf16>
    %cst = arith.constant dense<0.000000e+00> : vector<8x64xf32>
    %7 = tpu.matmul %4, %6, %cst {dimension_numbers = #tpu.dot_dimension_numbers<[1], [1], [0], [0], [0, 0, 1, 0], [], []>} : vector<8x32xbf16>, vector<64x32xbf16>, vector<8x64xf32> -> vector<8x64xf32>
    %c64_i32 = arith.constant 64 : i32
    %8 = arith.muli %arg1, %c64_i32 : i32
    %9 = tpu.iota {dimensions = array<i32: 1>} : vector<1x64xi32>
    %10 = vector.broadcast %8 : i32 to vector<1x64xi32>
    %11 = arith.addi %10, %9 : vector<1x64xi32>
    %c64_i32_4 = arith.constant 64 : i32
    %12 = vector.broadcast %c64_i32_4 : i32 to vector<1x64xi32>
    %13 = arith.cmpi slt, %11, %12 : vector<1x64xi32>
    %cst_5 = arith.constant 0xFF800000 : f32
    %14 = vector.shape_cast %13 : vector<1x64xi1> to vector<1x64xi1>
    %15 = vector.broadcast %14 : vector<1x64xi1> to vector<8x64xi1>
    %16 = vector.broadcast %cst_5 : f32 to vector<8x64xf32>
    %17 = arith.select %15, %7, %16 : vector<8x64xi1>, vector<8x64xf32>
    %c0_6 = arith.constant 0 : index
    %c0_7 = arith.constant 0 : index
    %18 = vector.load %arg3[%c0_6, %c0_7] : memref<8x1xi32, #tpu.memory_space<vmem>>, vector<8x1xi32>
    %19 = vector.broadcast %11 : vector<1x64xi32> to vector<8x64xi32>
    %20 = vector.broadcast %18 : vector<8x1xi32> to vector<8x64xi32>
    %21 = arith.cmpi eq, %19, %20 : vector<8x64xi32>
    %c0_8 = arith.constant 0 : index
    %c0_9 = arith.constant 0 : index
    %22 = vector.load %arg6[%c0_8, %c0_9] : memref<8x1xf32, #tpu.memory_space<vmem>>, vector<8x1xf32>
    %cst_10 = arith.constant 0.000000e+00 : f32
    %23 = vector.broadcast %cst_10 : f32 to vector<8x64xf32>
    %24 = arith.select %21, %17, %23 : vector<8x64xi1>, vector<8x64xf32>
    %cst_11 = arith.constant dense<0.000000e+00> : vector<8xf32>
    %25 = vector.multi_reduction <add>, %24, %cst_11 [1] : vector<8x64xf32> to vector<8xf32>
    %26 = vector.shape_cast %25 : vector<8xf32> to vector<8x1xf32>
    %27 = arith.addf %22, %26 : vector<8x1xf32>
    %c0_12 = arith.constant 0 : index
    %c0_13 = arith.constant 0 : index
    %28 = vector.load %arg6[%c0_12, %c0_13] : memref<8x1xf32, #tpu.memory_space<vmem>>, vector<8x1xf32>
    tpu.vector_store %arg6[%c0_12, %c0_13], %27 {strides = array<i32>} : memref<8x1xf32, #tpu.memory_space<vmem>>, vector<8x1xf32>,
    %c0_14 = arith.constant 0 : index
    %c0_15 = arith.constant 0 : index
    %29 = vector.load %arg7[%c0_14, %c0_15] : memref<8x1xf32, #tpu.memory_space<vmem>>, vector<8x1xf32>
    %cst_16 = arith.constant dense<0xFF800000> : vector<8xf32>
    %30 = vector.multi_reduction <maximumf>, %17, %cst_16 [1] : vector<8x64xf32> to vector<8xf32>
    %31 = vector.shape_cast %30 : vector<8xf32> to vector<8x1xf32>
    %32 = arith.maximumf %29, %31 : vector<8x1xf32>
    %c0_17 = arith.constant 0 : index
    %c0_18 = arith.constant 0 : index
    %33 = vector.load %arg8[%c0_17, %c0_18] : memref<8x1xf32, #tpu.memory_space<vmem>>, vector<8x1xf32>
    %34 = arith.subf %29, %32 : vector<8x1xf32>
    %35 = math.exp %34 : vector<8x1xf32>
    %36 = arith.mulf %33, %35 : vector<8x1xf32>
    %37 = vector.broadcast %32 : vector<8x1xf32> to vector<8x64xf32>
    %38 = arith.subf %17, %37 : vector<8x64xf32>
    %39 = math.exp %38 : vector<8x64xf32>
    %cst_19 = arith.constant dense<0.000000e+00> : vector<8xf32>
    %40 = vector.multi_reduction <add>, %39, %cst_19 [1] : vector<8x64xf32> to vector<8xf32>
    %41 = vector.shape_cast %40 : vector<8xf32> to vector<8x1xf32>
    %42 = arith.addf %36, %41 : vector<8x1xf32>
    %c0_20 = arith.constant 0 : index
    %c0_21 = arith.constant 0 : index
    %43 = vector.load %arg8[%c0_20, %c0_21] : memref<8x1xf32, #tpu.memory_space<vmem>>, vector<8x1xf32>
    tpu.vector_store %arg8[%c0_20, %c0_21], %42 {strides = array<i32>} : memref<8x1xf32, #tpu.memory_space<vmem>>, vector<8x1xf32>,
    %c0_22 = arith.constant 0 : index
    %c0_23 = arith.constant 0 : index
    %44 = vector.load %arg7[%c0_22, %c0_23] : memref<8x1xf32, #tpu.memory_space<vmem>>, vector<8x1xf32>
    tpu.vector_store %arg7[%c0_22, %c0_23], %32 {strides = array<i32>} : memref<8x1xf32, #tpu.memory_space<vmem>>, vector<8x1xf32>,
    %c0_i32_24 = arith.constant 0 : i32
    %45 = arith.cmpi eq, %arg1, %c0_i32_24 : i32
    %46 = arith.extui %45 : i1 to i32
    %c0_i32_25 = arith.constant 0 : i32
    %47 = arith.cmpi ne, %46, %c0_i32_25 : i32
    scf.if %47 {
      %c0_26 = arith.constant 0 : index
      %c0_27 = arith.constant 0 : index
      %48 = vector.load %arg7[%c0_26, %c0_27] : memref<8x1xf32, #tpu.memory_space<vmem>>, vector<8x1xf32>
      %c0_28 = arith.constant 0 : index
      %c0_29 = arith.constant 0 : index
      %49 = vector.load %arg8[%c0_28, %c0_29] : memref<8x1xf32, #tpu.memory_space<vmem>>, vector<8x1xf32>
      %50 = math.log %49 : vector<8x1xf32>
      %51 = arith.addf %48, %50 : vector<8x1xf32>
      %c0_30 = arith.constant 0 : index
      %c0_31 = arith.constant 0 : index
      %52 = vector.load %arg5[%c0_30, %c0_31] : memref<8x1xf32, #tpu.memory_space<vmem>>, vector<8x1xf32>
      tpu.vector_store %arg5[%c0_30, %c0_31], %51 {strides = array<i32>} : memref<8x1xf32, #tpu.memory_space<vmem>>, vector<8x1xf32>,
    } else {
    }
    return
  }
  func.func @transform_0(%arg0: i32, %arg1: i32) -> (i32, i32) {
    %c0_i32 = arith.constant 0 : i32
    %c0_i32_0 = arith.constant 0 : i32
    return %arg0, %c0_i32 : i32, i32
  }
  func.func @transform_1(%arg0: i32, %arg1: i32) -> (i32, i32) {
    %c0_i32 = arith.constant 0 : i32
    %c0_i32_0 = arith.constant 0 : i32
    return %arg0, %c0_i32 : i32, i32
  }
  func.func @transform_2(%arg0: i32, %arg1: i32) -> (i32, i32) {
    %c0_i32 = arith.constant 0 : i32
    %c0_i32_0 = arith.constant 0 : i32
    return %arg1, %c0_i32 : i32, i32
  }
  func.func @transform_3(%arg0: i32, %arg1: i32) -> (i32, i32) {
    %c0_i32 = arith.constant 0 : i32
    %c0_i32_0 = arith.constant 0 : i32
    return %arg0, %c0_i32 : i32, i32
  }
  func.func @transform_4(%arg0: i32, %arg1: i32) -> (i32, i32) {
    %c0_i32 = arith.constant 0 : i32
    %c0_i32_0 = arith.constant 0 : i32
    return %arg0, %c0_i32 : i32, i32
  }
}

</mosaic_0001>

<bundles_post_ra>
// kernel: comi_forward.3
= control target key start
LH: loop header
LB: loop body
LE: loop exit
PB: predicated region body
PF: predicated region fallthrough
CT: control target
= control target key end

     0   :  { %v189_v0 = vmov 0.0   ;;  %vm39_vm0 = vcmask 261120   ;;  %vm190_vm1 = vmmov 0   ;;  %v191_v4 = vmov 0   ;;  %s282_s2 = inlined_call_operand.vmem [shape: f32[64,32], index: 2, kind: input, shape index: {}]   ;;  %s283_s1 = inlined_call_operand.vmem [shape: s32[8,1], index: 1, kind: input, shape index: {}]   ;;  %s284_s0 = inlined_call_operand.vmem [shape: f32[8,32], index: 0, kind: input, shape index: {}]   ;;  %s285_s4 = inlined_call_operand.vmem [shape: f32[8,1], index: 4, kind: output, shape index: {1}]   ;;  %s286_s3 = inlined_call_operand.vmem [shape: f32[8,1], index: 3, kind: output, shape index: {0}]  }
   0x1   :  { %165 = vmatprep.subr.bf16.mxu0 %v189_v0  ;;  %v27_v1 = vld [vmem:[%s282_s2] sm:$0xff]  ;;  %v28_v2 = vld [vmem:[%s282_s2 + $0x8] sm:$0xff]  ;;  %173 = vmatprep.mubr.msk.bf16.mxu0 %vm190_vm1, %v189_v0  ;;  %v29_v5 = vld [vmem:[%s282_s2 + $0x10] sm:$0xff]  ;;  %vm21_vm2 = vcmask 7168   ;;  %v192_v21 = vmov -inf   ;;  %v96_v22 = vlaneseq  ;;  %vm111_vm4 = vcmask 523264  }
   0x2   :  { %v35_v3 = vpack.c.bf16 %v28_v2, %v27_v1  ;;  %182 = vset.pattern.permute.xlu1 %v191_v4  ;;  %181 = vset.pattern.permute.xlu0 %v191_v4  ;;  %v30_v6 = vld [vmem:[%s282_s2 + $0x18] sm:$0xff]  ;;  %v104_v8 = vld [vmem:[%s283_s1] sm:$0xff]  ;;  %v32_v12 = vld [vmem:[%s282_s2 + $0x28] sm:$0xff]  ;;  %22 = vst.msk [vmem:[#allocation2] sm:$0xff] %vm21_vm2, %v192_v21 }
   0x3   :  { %106 = vperm.xlu1 %182, %v104_v8   ;;  %v36_v9 = vpack.c.bf16 %v30_v6, %v29_v5  ;;  %v31_v11 = vld [vmem:[%s282_s2 + $0x20] sm:$0xff]  ;;  %v33_v15 = vld [vmem:[%s282_s2 + $0x30] sm:$0xff]  ;;  %v34_v16 = vld [vmem:[%s282_s2 + $0x38] sm:$0xff]  ;;  %23 = vst.msk [vmem:[#allocation3] sm:$0xff] %vm21_vm2, %v189_v0  ;;  %v97_v23 = vand.u32 127, %v96_v22 }
   0x4   :  { %v44_v7 = vsel %vm39_vm0, %v35_v3, 0  ;;  %v37_v13 = vpack.c.bf16 %v32_v12, %v31_v11  ;;  %v38_v17 = vpack.c.bf16 %v34_v16, %v33_v15  ;;  %v25_v19 = vld [vmem:[%s284_s0] sm:$0xff]  ;;  %24 = vst.msk [vmem:[%s285_s4] sm:$0xff] %vm21_vm2, %v189_v0 }
   0x5   :  { %166 = vmatpush3.bf16.xpose.msra.mxu0 %v44_v7  ;;  %v47_v10 = vsel %vm39_vm0, %v36_v9, 0  ;;  %v26_v20 = vpack.c.bf16 %v25_v19, %v25_v19  ;;  %vm100_vm3 = vcmp.lt.s32.totalorder %v97_v23, 64 }
   0x6   :  { %167 = vmatprep.subr.bf16.mxu0 %v189_v0  ;;  %v50_v14 = vsel %vm39_vm0, %v37_v13, 0  ;;  %v53_v18 = vsel %vm39_vm0, %v38_v17, 0 }
   0x9   :  { %v118_v30 = vld [vmem:[#allocation2] sm:$0xff] }
   0xa   :  { %v123_v44 = vld [vmem:[#allocation3] sm:$0xff] }
   0xb   :  { %v109_v48 = vld [vmem:[%s285_s4] sm:$0xff] }
   0xd   :  { %168 = vmatpush3.bf16.xpose.msra.mxu0 %v47_v10 }
   0xe   :  { %169 = vmatprep.subr.bf16.mxu0 %v189_v0 }
  0x15   :  { %170 = vmatpush3.bf16.xpose.msra.mxu0 %v50_v14 }
  0x16   :  { %171 = vmatprep.subr.bf16.mxu0 %v189_v0 }
  0x1d   :  { %172 = vmatpush3.bf16.xpose.msra.mxu0 %v53_v18 }
  0x24   :  { %174 = vmatmul.mubr.msk.bf16.vlgmr.msra.gmra.mrb[0].mxu0 %vm39_vm0, %v26_v20 }
  0x82   :  { %v107_v37 = vpop.permute.xlu1 %106 }
  0x83   :  { %vm108_vm5 = vcmp.eq.s32.totalorder %v97_v23, %v107_v37 }
  0xf7   :  { %v89_v24 = vpop.f32.mrb[0].mxu0 }
  0xf8   :  { %v103_v25 = vsel %vm100_vm3, %v89_v24, -inf  ;;  %v175_v26 = vpop.f32.mrb[1].mxu0 }
  0xf9   :  { %v92_v27 = vpop.f32.mrb[2].mxu0  ;;  %v119_v28 = vsel %vm111_vm4, %v103_v25, -inf  ;;  %v110_v40 = vsel %vm108_vm5, %v103_v25, 0.0 }
  0xfa   :  { %120 = vmax.xlane.f32.xlu0 %v119_v28  ;;  %v176_v29 = vpop.f32.mrb[3].mxu0  ;;  %v112_v41 = vsel %vm111_vm4, %v110_v40, 0.0 }
 0x187   :  { %v121_v31 = vpop.xlane.xlu0 %120 }
 0x188   :  { %v122_v32 = vmax.f32 %v118_v30, %v121_v31 }
 0x18a   :  { %v124_v33 = vsub.f32 %v118_v30, %v122_v32  ;;  %141 = vst.msk [vmem:[#allocation2] sm:$0xff] %vm21_vm2, %v122_v32  ;;  %130 = vperm.xlu0 %181, %v122_v32  }
 0x18c   :  { %v125_v42 = vmul.f32 1.442695, %v124_v33 }
 0x191   :  { %v145_v54 = vld [vmem:[#allocation2] sm:$0xff] }
 0x209   :  { %v131_v34 = vpop.permute.xlu0 %130 }
 0x20a   :  { %v133_v35 = vsub.f32 %v103_v25, %v131_v34 }
 0x20c   :  { %v134_v36 = vmul.f32 1.442695, %v133_v35 }
 0x20e   :  { %183 = vpow2.f32 %v134_v36 }
 0x20f   :  { %185 = vpow2.f32 %v125_v42 }
 0x218   :  { %v184_v38 = vpop.eup %183 }
 0x219   :  { %v136_v39 = vsel %vm111_vm4, %v184_v38, 0.0  ;;  %v186_v43 = vpop.eup %185 }
 0x21a   :  { %137 = vadd.xlane.f32.xlu1 %v136_v39  ;;  %v127_v45 = vmul.f32 %v186_v43, %v123_v44 }
 0x21e   :  { %113 = vadd.xlane.f32.xlu1 %v112_v41 }
 0x2a7   :  { %v138_v46 = vpop.xlane.xlu1 %137 }
 0x2a8   :  { %v139_v47 = vadd.f32 %v138_v46, %v127_v45 }
 0x2aa   :  { %140 = vst.msk [vmem:[#allocation3] sm:$0xff] %vm21_vm2, %v139_v47 }
 0x2ab   :  { %v114_v49 = vpop.xlane.xlu1 %113 }
 0x2ac   :  { %v115_v50 = vadd.f32 %v114_v49, %v109_v48 }
 0x2ae   :  { %117 = vst.msk [vmem:[%s285_s4] sm:$0xff] %vm21_vm2, %v115_v50 }
 0x2b1   :  { %v146_v51 = vld [vmem:[#allocation3] sm:$0xff] }
 0x2b2   :  { %187 = vlog2.f32 %v146_v51 }
 0x2bc   :  { %v188_v52 = vpop.eup %187 }
 0x2bd   :  { %v148_v53 = vmul.f32 0.6931472, %v188_v52 }
 0x2bf   :  { %v149_v55 = vadd.f32 %v148_v53, %v145_v54 }
 0x2c1   :  { %150 = vst.msk [vmem:[%s286_s3] sm:$0xff] %vm21_vm2, %v149_v55 }

// kernel: comi_forward.2
= control target key start
LH: loop header
LB: loop body
LE: loop exit
PB: predicated region body
PF: predicated region fallthrough
CT: control target
= control target key end

     0   :  { %vm410_vm0 = vcmask 261120   ;;  %v3384_v16 = vmov 0   ;;  %s4680_s2 = inlined_call_operand.vmem [shape: bf16[8,256,32], index: 2, kind: input, shape index: {}]   ;;  %s4681_s0 = inlined_call_operand.vmem [shape: f32[8,8,32], index: 0, kind: input, shape index: {}]   ;;  %s4682_s1 = inlined_call_operand.vmem [shape: f32[8,8,1], index: 1, kind: input, shape index: {}]   ;;  %s4683_s3 = inlined_call_operand.vmem [shape: bf16[256,256], index: 3, kind: input, shape index: {}]   ;;  %s4684_s4 = inlined_call_operand.vmem [shape: f32[8,256], index: 4, kind: output, shape index: {}]  }
   0x1   :  { %v3107_v0 = vld [vmem:[%s4680_s2 + $0x40] sm:$0xff]   ;;  %v3111_v5 = vld [vmem:[%s4680_s2 + $0x48] sm:$0xff]   ;;  %v3115_v11 = vld [vmem:[%s4680_s2 + $0x50] sm:$0xff]   ;;  %3105 = vset.pattern.permute.xlu0 %v3384_v16  ;;  %3106 = vset.pattern.permute.xlu1 %v3384_v16 }
   0x2   :  { %v3108_v1 = vld [vmem:[%s4680_s2 + $0xc0] sm:$0xff]   ;;  %3040 = vmatprep.subr.msk.bf16.mxu0 %vm410_vm0, %v3107_v0  ;;  %v3112_v7 = vld [vmem:[%s4680_s2 + $0xc8] sm:$0xff]   ;;  %v3116_v13 = vld [vmem:[%s4680_s2 + $0xd0] sm:$0xff]  }
   0x3   :  { %v3109_v2 = vld [vmem:[%s4680_s2] sm:$0xff]   ;;  %3048 = vmatprep.subr.msk.bf16.mxu1 %vm410_vm0, %v3108_v1  ;;  %v3113_v8 = vld [vmem:[%s4680_s2 + $0x8] sm:$0xff]   ;;  %v3117_v14 = vld [vmem:[%s4680_s2 + $0x10] sm:$0xff]  }
   0x4   :  { %v3110_v3 = vld [vmem:[%s4680_s2 + $0x80] sm:$0xff]   ;;  %v415_v4 = vsel %vm410_vm0, %v3109_v2, 0  ;;  %v3114_v9 = vld [vmem:[%s4680_s2 + $0x88] sm:$0xff]   ;;  %v418_v10 = vsel %vm410_vm0, %v3113_v8, 0  ;;  %v3118_v15 = vld [vmem:[%s4680_s2 + $0x90] sm:$0xff]   ;;  %v421_v17 = vsel %vm410_vm0, %v3117_v14, 0 }
   0x5   :  { %2897 = vmatpush3.bf16.xpose.msra.mxu0 %v415_v4  ;;  %v587_v6 = vsel %vm410_vm0, %v3110_v3, 0  ;;  %v590_v12 = vsel %vm410_vm0, %v3114_v9, 0  ;;  %v3119_v18 = vld [vmem:[%s4680_s2 + $0x58] sm:$0xff]   ;;  %v593_v19 = vsel %vm410_vm0, %v3118_v15, 0  ;;  %v3123_v24 = vld [vmem:[%s4680_s2 + $0x60] sm:$0xff]   ;;  %v19_v30 = vld [vmem:[%s4681_s0 + $0x8] sm:$0xff] }
   0x6   :  { %2915 = vmatpush3.bf16.xpose.msra.mxu1 %v587_v6  ;;  %3041 = vmatprep.subr.msk.bf16.mxu0 %vm410_vm0, %v3111_v5  ;;  %v3120_v20 = vld [vmem:[%s4680_s2 + $0xd8] sm:$0xff]   ;;  %v3124_v26 = vld [vmem:[%s4680_s2 + $0xe0] sm:$0xff]   ;;  %v323_v32 = vpack.c.bf16 %v19_v30, %v19_v30  ;;  %v3127_v34 = vld [vmem:[%s4680_s2 + $0x68] sm:$0xff]  }
   0x7   :  { %3049 = vmatprep.subr.msk.bf16.mxu1 %vm410_vm0, %v3112_v7  ;;  %v3121_v21 = vld [vmem:[%s4680_s2 + $0x18] sm:$0xff]   ;;  %v3125_v27 = vld [vmem:[%s4680_s2 + $0x20] sm:$0xff]   ;;  %v3128_v36 = vld [vmem:[%s4680_s2 + $0xe8] sm:$0xff]  }
   0x8   :  { %v3122_v22 = vld [vmem:[%s4680_s2 + $0x98] sm:$0xff]   ;;  %v424_v23 = vsel %vm410_vm0, %v3121_v21, 0  ;;  %v3126_v28 = vld [vmem:[%s4680_s2 + $0xa0] sm:$0xff]   ;;  %v427_v33 = vsel %vm410_vm0, %v3125_v27, 0  ;;  %2930 = vmatprep.mubr.msk.bf16.mxu1 %vm410_vm0, %v323_v32  ;;  %v3129_v37 = vld [vmem:[%s4680_s2 + $0x28] sm:$0xff]  }
   0x9   :  { %v596_v25 = vsel %vm410_vm0, %v3122_v22, 0  ;;  %v18_v29 = vld [vmem:[%s4681_s0] sm:$0xff]  ;;  %v599_v35 = vsel %vm410_vm0, %v3126_v28, 0  ;;  %v3130_v38 = vld [vmem:[%s4680_s2 + $0xa8] sm:$0xff]   ;;  %v430_v39 = vsel %vm410_vm0, %v3129_v37, 0  ;;  %v3131_v40 = vld [vmem:[%s4680_s2 + $0x70] sm:$0xff]  }
   0xa   :  { %v322_v31 = vpack.c.bf16 %v18_v29, %v18_v29  ;;  %v602_v41 = vsel %vm410_vm0, %v3130_v38, 0  ;;  %v3132_v42 = vld [vmem:[%s4680_s2 + $0xf0] sm:$0xff]   ;;  %v3135_v46 = vld [vmem:[%s4680_s2 + $0x78] sm:$0xff]   ;;  %v3139_v52 = vld [vmem:[%s4680_s2 + $0x140] sm:$0xff]  }
   0xb   :  { %v3133_v43 = vld [vmem:[%s4680_s2 + $0x30] sm:$0xff]   ;;  %v3136_v48 = vld [vmem:[%s4680_s2 + $0xf8] sm:$0xff]   ;;  %v3140_v54 = vld [vmem:[%s4680_s2 + $0x1c0] sm:$0xff]  }
   0xc   :  { %2912 = vmatprep.mubr.msk.bf16.mxu0 %vm410_vm0, %v322_v31  ;;  %v3134_v44 = vld [vmem:[%s4680_s2 + $0xb0] sm:$0xff]   ;;  %v433_v45 = vsel %vm410_vm0, %v3133_v43, 0  ;;  %v3137_v49 = vld [vmem:[%s4680_s2 + $0x38] sm:$0xff]   ;;  %v3141_v55 = vld [vmem:[%s4680_s2 + $0x100] sm:$0xff]  }
   0xd   :  { %2899 = vmatpush3.bf16.xpose.msra.mxu0 %v418_v10  ;;  %v605_v47 = vsel %vm410_vm0, %v3134_v44, 0  ;;  %v3138_v50 = vld [vmem:[%s4680_s2 + $0xb8] sm:$0xff]   ;;  %v436_v51 = vsel %vm410_vm0, %v3137_v49, 0  ;;  %v3142_v56 = vld [vmem:[%s4680_s2 + $0x180] sm:$0xff]   ;;  %v20_v57 = vld [vmem:[%s4681_s0 + $0x10] sm:$0xff]  ;;  %v759_v59 = vsel %vm410_vm0, %v3141_v55, 0 }
   0xe   :  { %2917 = vmatpush3.bf16.xpose.msra.mxu1 %v590_v12  ;;  %3042 = vmatprep.subr.msk.bf16.mxu0 %vm410_vm0, %v3115_v11  ;;  %v608_v53 = vsel %vm410_vm0, %v3138_v50, 0  ;;  %v21_v58 = vld [vmem:[%s4681_s0 + $0x18] sm:$0xff]  ;;  %v3143_v60 = vld [vmem:[%s4680_s2 + $0x148] sm:$0xff]   ;;  %v931_v61 = vsel %vm410_vm0, %v3142_v56, 0  ;;  %v3574_v63 = vpack.c.bf16 %v20_v57, %v20_v57  ;;  %v3147_v4 = vld [vmem:[%s4680_s2 + $0x150] sm:$0xff]  }
   0xf   :  { %3050 = vmatprep.subr.msk.bf16.mxu1 %vm410_vm0, %v3116_v13  ;;  %v3144_v62 = vld [vmem:[%s4680_s2 + $0x1c8] sm:$0xff]   ;;  %v3577_v0 = vpack.c.bf16 %v21_v58, %v21_v58  ;;  %v3148_v6 = vld [vmem:[%s4680_s2 + $0x1d0] sm:$0xff]   ;;  %v26_v7 = vld [vmem:[%s4682_s1] sm:$0xff] }
  0x10   :  { %v3145_v1 = vld [vmem:[%s4680_s2 + $0x108] sm:$0xff]   ;;  %1725 = vperm.xlu0 %3105, %v26_v7   ;;  %v3149_v9 = vld [vmem:[%s4680_s2 + $0x110] sm:$0xff]   ;;  %v3151_v12 = vld [vmem:[%s4680_s2 + $0x158] sm:$0xff]  }
  0x11   :  { %v3146_v2 = vld [vmem:[%s4680_s2 + $0x188] sm:$0xff]   ;;  %v762_v3 = vsel %vm410_vm0, %v3145_v1, 0  ;;  %v3150_v10 = vld [vmem:[%s4680_s2 + $0x190] sm:$0xff]   ;;  %v765_v11 = vsel %vm410_vm0, %v3149_v9, 0  ;;  %v3152_v14 = vld [vmem:[%s4680_s2 + $0x1d8] sm:$0xff]  }
  0x12   :  { %v934_v5 = vsel %vm410_vm0, %v3146_v2, 0  ;;  %v27_v8 = vld [vmem:[%s4682_s1 + $0x8] sm:$0xff]  ;;  %v937_v13 = vsel %vm410_vm0, %v3150_v10, 0  ;;  %v3153_v15 = vld [vmem:[%s4680_s2 + $0x118] sm:$0xff]   ;;  %v3157_v21 = vld [vmem:[%s4680_s2 + $0x120] sm:$0xff]  }
  0x13   :  { %v3154_v16 = vld [vmem:[%s4680_s2 + $0x198] sm:$0xff]   ;;  %v3158_v22 = vld [vmem:[%s4680_s2 + $0x1a0] sm:$0xff]   ;;  %v3161_v27 = vld [vmem:[%s4680_s2 + $0x128] sm:$0xff]  }
  0x14   :  { %1730 = vperm.xlu0 %3105, %v27_v8   ;;  %v3162_v28 = vld [vmem:[%s4680_s2 + $0x1a8] sm:$0xff]   ;;  %v774_v29 = vsel %vm410_vm0, %v3161_v27, 0  ;;  %v3163_v30 = vld [vmem:[%s4680_s2 + $0x170] sm:$0xff]   ;;  %v3167_v38 = vld [vmem:[%s4680_s2 + $0x178] sm:$0xff]  }
  0x15   :  { %2901 = vmatpush3.bf16.xpose.msra.mxu0 %v421_v17  ;;  %v768_v17 = vsel %vm410_vm0, %v3153_v15, 0  ;;  %v3171_v44 = vld [vmem:[%s4680_s2 + $0x240] sm:$0xff]   ;;  %v23_v50 = vld [vmem:[%s4681_s0 + $0x28] sm:$0xff]  ;;  %v3183_v2 = vld [vmem:[%s4680_s2 + $0x258] sm:$0xff]  }
  0x16   :  { %2919 = vmatpush3.bf16.xpose.msra.mxu1 %v593_v19  ;;  %3043 = vmatprep.subr.msk.bf16.mxu0 %vm410_vm0, %v3119_v18  ;;  %v3155_v18 = vld [vmem:[%s4680_s2 + $0x160] sm:$0xff]   ;;  %v940_v19 = vsel %vm410_vm0, %v3154_v16, 0  ;;  %v3734_v56 = vpack.c.bf16 %v23_v50, %v23_v50  ;;  %v3177_v57 = vld [vmem:[%s4680_s2 + $0x208] sm:$0xff]   ;;  %v32_v15 = vld [vmem:[%s4682_s1 + $0x30] sm:$0xff] }
  0x17   :  { %3051 = vmatprep.subr.msk.bf16.mxu1 %vm410_vm0, %v3120_v20  ;;  %v3156_v20 = vld [vmem:[%s4680_s2 + $0x1e0] sm:$0xff]   ;;  %v3178_v58 = vld [vmem:[%s4680_s2 + $0x288] sm:$0xff]   ;;  %v33_v16 = vld [vmem:[%s4682_s1 + $0x38] sm:$0xff] }
  0x18   :  { %v22_v49 = vld [vmem:[%s4681_s0 + $0x20] sm:$0xff]  ;;  %v31_v10 = vld [vmem:[%s4682_s1 + $0x28] sm:$0xff]  ;;  %v3197_v27 = vld [vmem:[%s4680_s2 + $0x230] sm:$0xff]  }
  0x19   :  { %v3730_v55 = vpack.c.bf16 %v22_v49, %v22_v49  ;;  %v30_v7 = vld [vmem:[%s4682_s1 + $0x20] sm:$0xff]  ;;  %v3209_v49 = vld [vmem:[%s4680_s2 + $0x308] sm:$0xff]  }
  0x1a   :  { %1745 = vperm.xlu0 %3105, %v30_v7   ;;  %v3187_v9 = vld [vmem:[%s4680_s2 + $0x260] sm:$0xff]   ;;  %v3210_v50 = vld [vmem:[%s4680_s2 + $0x388] sm:$0xff]  }
  0x1d   :  { %2903 = vmatpush3.bf16.xpose.msra.mxu0 %v424_v23  ;;  %v771_v23 = vsel %vm410_vm0, %v3157_v21, 0  ;;  %v3193_v21 = vld [vmem:[%s4680_s2 + $0x228] sm:$0xff]  }
  0x1e   :  { %2921 = vmatpush3.bf16.xpose.msra.mxu1 %v596_v25  ;;  %3044 = vmatprep.subr.msk.bf16.mxu0 %vm410_vm0, %v3123_v24  ;;  %v3159_v24 = vld [vmem:[%s4680_s2 + $0x168] sm:$0xff]   ;;  %v943_v25 = vsel %vm410_vm0, %v3158_v22, 0 }
  0x1f   :  { %3052 = vmatprep.subr.msk.bf16.mxu1 %vm410_vm0, %v3124_v26  ;;  %v3160_v26 = vld [vmem:[%s4680_s2 + $0x1e8] sm:$0xff]   ;;  %1755 = vperm.xlu0 %3105, %v32_v15   ;;  %v3229_v15 = vld [vmem:[%s4680_s2 + $0x330] sm:$0xff]  }
  0x20   :  { %v3194_v22 = vld [vmem:[%s4680_s2 + $0x2a8] sm:$0xff]  }
  0x25   :  { %2905 = vmatpush3.bf16.xpose.msra.mxu0 %v427_v33  ;;  %v3165_v33 = vld [vmem:[%s4680_s2 + $0x130] sm:$0xff]  }
  0x26   :  { %2923 = vmatpush3.bf16.xpose.msra.mxu1 %v599_v35  ;;  %3045 = vmatprep.subr.msk.bf16.mxu0 %vm410_vm0, %v3127_v34  ;;  %v28_v34 = vld [vmem:[%s4682_s1 + $0x10] sm:$0xff]  ;;  %v777_v37 = vsel %vm410_vm0, %v3165_v33, 0  ;;  %v3201_v33 = vld [vmem:[%s4680_s2 + $0x238] sm:$0xff]  }
  0x27   :  { %3053 = vmatprep.subr.msk.bf16.mxu1 %vm410_vm0, %v3128_v36  ;;  %v3166_v35 = vld [vmem:[%s4680_s2 + $0x1b0] sm:$0xff]   ;;  %1735 = vperm.xlu1 %3106, %v28_v34   ;;  %v29_v36 = vld [vmem:[%s4682_s1 + $0x18] sm:$0xff] }
  0x28   :  { %v3202_v34 = vld [vmem:[%s4680_s2 + $0x2b8] sm:$0xff]  }
  0x2b   :  { %1740 = vperm.xlu1 %3106, %v29_v36   ;;  %v3203_v36 = vld [vmem:[%s4680_s2 + $0x340] sm:$0xff]  }
  0x2d   :  { %2907 = vmatpush3.bf16.xpose.msra.mxu0 %v430_v39  ;;  %v949_v39 = vsel %vm410_vm0, %v3166_v35, 0  ;;  %v1124_v35 = vsel %vm410_vm0, %v3201_v33, 0  ;;  %v4021_v33 = vld [vmem:[%s4683_s3 + $0x4] ss:$8 sps:$4 sm:$0xff]  }
  0x2e   :  { %2925 = vmatpush3.bf16.xpose.msra.mxu1 %v602_v41  ;;  %3046 = vmatprep.subr.msk.bf16.mxu0 %vm410_vm0, %v3131_v40  ;;  %v3168_v40 = vld [vmem:[%s4680_s2 + $0x1f8] sm:$0xff]  }
  0x2f   :  { %3054 = vmatprep.subr.msk.bf16.mxu1 %vm410_vm0, %v3132_v42  ;;  %v3169_v41 = vld [vmem:[%s4680_s2 + $0x138] sm:$0xff]   ;;  %1750 = vperm.xlu1 %3106, %v31_v10   ;;  %v3226_v10 = vld [vmem:[%s4680_s2 + $0x3a8] sm:$0xff]  }
  0x30   :  { %v3170_v42 = vld [vmem:[%s4680_s2 + $0x1b8] sm:$0xff]   ;;  %v780_v43 = vsel %vm410_vm0, %v3169_v41, 0  ;;  %v24_v41 = vld [vmem:[%s4681_s0 + $0x30] sm:$0xff] }
  0x33   :  { %1760 = vperm.xlu1 %3106, %v33_v16   ;;  %v3230_v16 = vld [vmem:[%s4680_s2 + $0x3b0] sm:$0xff]  }
  0x35   :  { %2909 = vmatpush3.bf16.xpose.msra.mxu0 %v433_v45  ;;  %v952_v45 = vsel %vm410_vm0, %v3170_v42, 0  ;;  %v25_v42 = vld [vmem:[%s4681_s0 + $0x38] sm:$0xff] }
  0x36   :  { %2927 = vmatpush3.bf16.xpose.msra.mxu1 %v605_v47  ;;  %3047 = vmatprep.subr.msk.bf16.mxu0 %vm410_vm0, %v3135_v46  ;;  %v3172_v46 = vld [vmem:[%s4680_s2 + $0x2c0] sm:$0xff]  }
  0x37   :  { %3055 = vmatprep.subr.msk.bf16.mxu1 %vm410_vm0, %v3136_v48  ;;  %v3173_v47 = vld [vmem:[%s4680_s2 + $0x200] sm:$0xff]  }
  0x38   :  { %v3174_v48 = vld [vmem:[%s4680_s2 + $0x280] sm:$0xff]  }
  0x3d   :  { %2911 = vmatpush3.bf16.xpose.msra.mxu0 %v436_v51  ;;  %v1103_v51 = vsel %vm410_vm0, %v3173_v47, 0  ;;  %v3888_v47 = vpack.c.bf16 %v24_v41, %v24_v41  ;;  %v4074_v41 = vld [vmem:[%s4683_s3 + $0x44] ss:$8 sps:$4 sm:$0xff]  }
  0x3e   :  { %2929 = vmatpush3.bf16.xpose.msra.mxu1 %v608_v53  ;;  %3056 = vmatprep.subr.msk.bf16.mxu0 %vm410_vm0, %v3139_v52  ;;  %v3175_v52 = vld [vmem:[%s4680_s2 + $0x248] sm:$0xff]   ;;  %v1275_v53 = vsel %vm410_vm0, %v3174_v48, 0  ;;  %v3892_v48 = vpack.c.bf16 %v25_v42, %v25_v42 }
  0x3f   :  { %3064 = vmatprep.subr.msk.bf16.mxu1 %vm410_vm0, %v3140_v54  ;;  %v3176_v54 = vld [vmem:[%s4680_s2 + $0x2c8] sm:$0xff]  }
  0x40   :  { %v4080_v42 = vld [vmem:[%s4683_s3 + $0x40] ss:$8 sps:$4 sm:$0xff]  }
  0x44   :  { %2913 = vmatmul.mubr.msk.bf16.vlgmr.msra.gmra.mrb[0].mxu0 %vm410_vm0, %v322_v31  ;;  %v946_v31 = vsel %vm410_vm0, %v3162_v28, 0  ;;  %v3198_v28 = vld [vmem:[%s4680_s2 + $0x2b0] sm:$0xff]  }
  0x45   :  { %2931 = vmatmul.mubr.msk.bf16.vlgmr.msra.gmra.mrb[0].mxu1 %vm410_vm0, %v323_v32  ;;  %2933 = vmatpush3.bf16.xpose.msra.mxu0 %v759_v59  ;;  %v3164_v32 = vld [vmem:[%s4680_s2 + $0x1f0] sm:$0xff]   ;;  %v1106_v59 = vsel %vm410_vm0, %v3177_v57, 0 }
  0x46   :  { %2951 = vmatpush3.bf16.xpose.msra.mxu1 %v931_v61  ;;  %3057 = vmatprep.subr.msk.bf16.mxu0 %vm410_vm0, %v3143_v60  ;;  %v3179_v60 = vld [vmem:[%s4680_s2 + $0x250] sm:$0xff]   ;;  %v1278_v61 = vsel %vm410_vm0, %v3178_v58, 0  ;;  %v3215_v58 = vld [vmem:[%s4680_s2 + $0x358] sm:$0xff]  }
  0x47   :  { %3065 = vmatprep.subr.msk.bf16.mxu1 %vm410_vm0, %v3144_v62  ;;  %2948 = vmatprep.mubr.msk.bf16.mxu0 %vm410_vm0, %v3574_v63  ;;  %v3180_v62 = vld [vmem:[%s4680_s2 + $0x2d0] sm:$0xff]  }
  0x48   :  { %2966 = vmatprep.mubr.msk.bf16.mxu1 %vm410_vm0, %v3577_v0 }
  0x4d   :  { %2935 = vmatpush3.bf16.xpose.msra.mxu0 %v762_v3 }
  0x4e   :  { %2953 = vmatpush3.bf16.xpose.msra.mxu1 %v934_v5  ;;  %3058 = vmatprep.subr.msk.bf16.mxu0 %vm410_vm0, %v3147_v4  ;;  %v3184_v4 = vld [vmem:[%s4680_s2 + $0x2d8] sm:$0xff]  }
  0x4f   :  { %3066 = vmatprep.subr.msk.bf16.mxu1 %vm410_vm0, %v3148_v6  ;;  %v3185_v5 = vld [vmem:[%s4680_s2 + $0x218] sm:$0xff]  }
  0x50   :  { %v3186_v6 = vld [vmem:[%s4680_s2 + $0x298] sm:$0xff]   ;;  %v1112_v8 = vsel %vm410_vm0, %v3185_v5, 0 }
  0x55   :  { %2937 = vmatpush3.bf16.xpose.msra.mxu0 %v765_v11  ;;  %v1284_v11 = vsel %vm410_vm0, %v3186_v6, 0  ;;  %v3223_v6 = vld [vmem:[%s4680_s2 + $0x368] sm:$0xff]  }
  0x56   :  { %2955 = vmatpush3.bf16.xpose.msra.mxu1 %v937_v13  ;;  %3059 = vmatprep.subr.msk.bf16.mxu0 %vm410_vm0, %v3151_v12  ;;  %v3188_v12 = vld [vmem:[%s4680_s2 + $0x2e0] sm:$0xff]  }
  0x57   :  { %3067 = vmatprep.subr.msk.bf16.mxu1 %vm410_vm0, %v3152_v14  ;;  %v3189_v13 = vld [vmem:[%s4680_s2 + $0x220] sm:$0xff]  }
  0x58   :  { %v3190_v14 = vld [vmem:[%s4680_s2 + $0x2a0] sm:$0xff]  }
  0x5d   :  { %2939 = vmatpush3.bf16.xpose.msra.mxu0 %v768_v17  ;;  %v1115_v17 = vsel %vm410_vm0, %v3189_v13, 0  ;;  %v1634_v13 = vsel %vm410_vm0, %v3226_v10, 0 }
  0x5e   :  { %2957 = vmatpush3.bf16.xpose.msra.mxu1 %v940_v19  ;;  %3060 = vmatprep.subr.msk.bf16.mxu0 %vm410_vm0, %v3155_v18  ;;  %v3191_v18 = vld [vmem:[%s4680_s2 + $0x268] sm:$0xff]   ;;  %v1287_v19 = vsel %vm410_vm0, %v3190_v14, 0  ;;  %v3228_v14 = vld [vmem:[%s4680_s2 + $0x3f0] sm:$0xff]  }
  0x5f   :  { %3068 = vmatprep.subr.msk.bf16.mxu1 %vm410_vm0, %v3156_v20  ;;  %v3192_v20 = vld [vmem:[%s4680_s2 + $0x2e8] sm:$0xff]  }
  0x65   :  { %2941 = vmatpush3.bf16.xpose.msra.mxu0 %v771_v23  ;;  %v1118_v23 = vsel %vm410_vm0, %v3193_v21, 0  ;;  %v3233_v21 = vld [vmem:[%s4680_s2 + $0x338] sm:$0xff]  }
  0x66   :  { %2959 = vmatpush3.bf16.xpose.msra.mxu1 %v943_v25  ;;  %3061 = vmatprep.subr.msk.bf16.mxu0 %vm410_vm0, %v3159_v24  ;;  %v3195_v24 = vld [vmem:[%s4680_s2 + $0x270] sm:$0xff]   ;;  %v1290_v25 = vsel %vm410_vm0, %v3194_v22, 0  ;;  %v3234_v22 = vld [vmem:[%s4680_s2 + $0x3b8] sm:$0xff]  }
  0x67   :  { %3069 = vmatprep.subr.msk.bf16.mxu1 %vm410_vm0, %v3160_v26  ;;  %v3196_v26 = vld [vmem:[%s4680_s2 + $0x2f0] sm:$0xff]  }
  0x6d   :  { %2943 = vmatpush3.bf16.xpose.msra.mxu0 %v774_v29  ;;  %v1121_v29 = vsel %vm410_vm0, %v3197_v27, 0 }
  0x6e   :  { %2961 = vmatpush3.bf16.xpose.msra.mxu1 %v946_v31  ;;  %3062 = vmatprep.subr.msk.bf16.mxu0 %vm410_vm0, %v3163_v30  ;;  %v3199_v30 = vld [vmem:[%s4680_s2 + $0x278] sm:$0xff]   ;;  %v1293_v31 = vsel %vm410_vm0, %v3198_v28, 0 }
  0x6f   :  { %3070 = vmatprep.subr.msk.bf16.mxu1 %vm410_vm0, %v3164_v32  ;;  %v3200_v32 = vld [vmem:[%s4680_s2 + $0x2f8] sm:$0xff]  }
  0x75   :  { %2945 = vmatpush3.bf16.xpose.msra.mxu0 %v777_v37  ;;  %v1296_v37 = vsel %vm410_vm0, %v3202_v34, 0  ;;  %v4026_v34 = vld [vmem:[%s4683_s3] ss:$8 sps:$4 sm:$0xff]  }
  0x76   :  { %2963 = vmatpush3.bf16.xpose.msra.mxu1 %v949_v39  ;;  %3063 = vmatprep.subr.msk.bf16.mxu0 %vm410_vm0, %v3167_v38  ;;  %v3204_v38 = vld [vmem:[%s4680_s2 + $0x3c0] sm:$0xff]  }
  0x77   :  { %3071 = vmatprep.subr.msk.bf16.mxu1 %vm410_vm0, %v3168_v40  ;;  %v3205_v39 = vld [vmem:[%s4680_s2 + $0x300] sm:$0xff]  }
  0x78   :  { %v3206_v40 = vld [vmem:[%s4680_s2 + $0x380] sm:$0xff]  }
  0x7d   :  { %2947 = vmatpush3.bf16.xpose.msra.mxu0 %v780_v43  ;;  %v1447_v43 = vsel %vm410_vm0, %v3205_v39, 0  ;;  %v4060_v39 = vld [vmem:[%s4683_s3 + $0x34] ss:$8 sps:$4 sm:$0xff]  }
  0x7e   :  { %2965 = vmatpush3.bf16.xpose.msra.mxu1 %v952_v45  ;;  %3072 = vmatprep.subr.msk.bf16.mxu0 %vm410_vm0, %v3171_v44  ;;  %v3207_v44 = vld [vmem:[%s4680_s2 + $0x348] sm:$0xff]   ;;  %v1619_v45 = vsel %vm410_vm0, %v3206_v40, 0  ;;  %v4067_v40 = vld [vmem:[%s4683_s3 + $0x30] ss:$8 sps:$4 sm:$0xff]  }
  0x7f   :  { %3080 = vmatprep.subr.msk.bf16.mxu1 %vm410_vm0, %v3172_v46  ;;  %v3208_v46 = vld [vmem:[%s4680_s2 + $0x3c8] sm:$0xff]  }
  0x84   :  { %2949 = vmatmul.mubr.msk.bf16.vlgmr.msra.gmra.mrb[4].mxu0 %vm410_vm0, %v3574_v63  ;;  %v3181_v63 = vld [vmem:[%s4680_s2 + $0x210] sm:$0xff]  }
  0x85   :  { %2967 = vmatmul.mubr.msk.bf16.vlgmr.msra.gmra.mrb[4].mxu1 %vm410_vm0, %v3577_v0  ;;  %2969 = vmatpush3.bf16.xpose.msra.mxu0 %v1103_v51  ;;  %v3182_v0 = vld [vmem:[%s4680_s2 + $0x290] sm:$0xff]   ;;  %v1109_v1 = vsel %vm410_vm0, %v3181_v63, 0  ;;  %v1450_v51 = vsel %vm410_vm0, %v3209_v49, 0  ;;  %v4130_v49 = vld [vmem:[%s4683_s3 + $0x84] ss:$8 sps:$4 sm:$0xff]  }
  0x86   :  { %2987 = vmatpush3.bf16.xpose.msra.mxu1 %v1275_v53  ;;  %3073 = vmatprep.subr.msk.bf16.mxu0 %vm410_vm0, %v3175_v52  ;;  %v1281_v3 = vsel %vm410_vm0, %v3182_v0, 0  ;;  %v3211_v52 = vld [vmem:[%s4680_s2 + $0x350] sm:$0xff]   ;;  %v1622_v53 = vsel %vm410_vm0, %v3210_v50, 0  ;;  %v3219_v0 = vld [vmem:[%s4680_s2 + $0x360] sm:$0xff]  }
  0x87   :  { %3081 = vmatprep.subr.msk.bf16.mxu1 %vm410_vm0, %v3176_v54  ;;  %2984 = vmatprep.mubr.msk.bf16.mxu0 %vm410_vm0, %v3730_v55  ;;  %v3212_v54 = vld [vmem:[%s4680_s2 + $0x3d0] sm:$0xff]   ;;  %v4137_v50 = vld [vmem:[%s4683_s3 + $0x80] ss:$8 sps:$4 sm:$0xff]  }
  0x88   :  { %3002 = vmatprep.mubr.msk.bf16.mxu1 %vm410_vm0, %v3734_v56 }
  0x8d   :  { %2971 = vmatpush3.bf16.xpose.msra.mxu0 %v1106_v59 }
  0x8e   :  { %2989 = vmatpush3.bf16.xpose.msra.mxu1 %v1278_v61  ;;  %3074 = vmatprep.subr.msk.bf16.mxu0 %vm410_vm0, %v3179_v60  ;;  %v3216_v60 = vld [vmem:[%s4680_s2 + $0x3d8] sm:$0xff]  }
  0x8f   :  { %3082 = vmatprep.subr.msk.bf16.mxu1 %vm410_vm0, %v3180_v62  ;;  %v3217_v61 = vld [vmem:[%s4680_s2 + $0x318] sm:$0xff]  }
  0x90   :  { %v3218_v62 = vld [vmem:[%s4680_s2 + $0x398] sm:$0xff]   ;;  %v1456_v63 = vsel %vm410_vm0, %v3217_v61, 0 }
  0x95   :  { %2973 = vmatpush3.bf16.xpose.msra.mxu0 %v1109_v1  ;;  %v1628_v1 = vsel %vm410_vm0, %v3218_v62, 0  ;;  %v4197_v62 = vld [vmem:[%s4683_s3 + $0xc4] ss:$8 sps:$4 sm:$0xff]  }
  0x96   :  { %2991 = vmatpush3.bf16.xpose.msra.mxu1 %v1281_v3  ;;  %3075 = vmatprep.subr.msk.bf16.mxu0 %vm410_vm0, %v3183_v2  ;;  %v3220_v2 = vld [vmem:[%s4680_s2 + $0x3e0] sm:$0xff]  }
  0x97   :  { %3083 = vmatprep.subr.msk.bf16.mxu1 %vm410_vm0, %v3184_v4  ;;  %v3221_v3 = vld [vmem:[%s4680_s2 + $0x320] sm:$0xff]  }
  0x98   :  { %v3222_v4 = vld [vmem:[%s4680_s2 + $0x3a0] sm:$0xff]   ;;  %v1459_v5 = vsel %vm410_vm0, %v3221_v3, 0  ;;  %v4211_v3 = vld [vmem:[%s4683_s3 + $0xd4] ss:$8 sps:$4 sm:$0xff]  }
  0x99   :  { %v1631_v7 = vsel %vm410_vm0, %v3222_v4, 0  ;;  %v4216_v4 = vld [vmem:[%s4683_s3 + $0xd0] ss:$8 sps:$4 sm:$0xff]  }
  0x9d   :  { %2975 = vmatpush3.bf16.xpose.msra.mxu0 %v1112_v8  ;;  %v3224_v8 = vld [vmem:[%s4680_s2 + $0x3e8] sm:$0xff]  }
  0x9e   :  { %2993 = vmatpush3.bf16.xpose.msra.mxu1 %v1284_v11  ;;  %3076 = vmatprep.subr.msk.bf16.mxu0 %vm410_vm0, %v3187_v9  ;;  %v3225_v9 = vld [vmem:[%s4680_s2 + $0x328] sm:$0xff]  }
  0x9f   :  { %3084 = vmatprep.subr.msk.bf16.mxu1 %vm410_vm0, %v3188_v12  ;;  %v1462_v11 = vsel %vm410_vm0, %v3225_v9, 0  ;;  %v3227_v12 = vld [vmem:[%s4680_s2 + $0x370] sm:$0xff]  }
  0xa5   :  { %2977 = vmatpush3.bf16.xpose.msra.mxu0 %v1115_v17  ;;  %v1465_v17 = vsel %vm410_vm0, %v3229_v15, 0 }
  0xa6   :  { %2995 = vmatpush3.bf16.xpose.msra.mxu1 %v1287_v19  ;;  %3077 = vmatprep.subr.msk.bf16.mxu0 %vm410_vm0, %v3191_v18  ;;  %v3231_v18 = vld [vmem:[%s4680_s2 + $0x378] sm:$0xff]   ;;  %v1637_v19 = vsel %vm410_vm0, %v3230_v16, 0 }
  0xa7   :  { %3085 = vmatprep.subr.msk.bf16.mxu1 %vm410_vm0, %v3192_v20  ;;  %v3232_v20 = vld [vmem:[%s4680_s2 + $0x3f8] sm:$0xff]  }
  0xad   :  { %2979 = vmatpush3.bf16.xpose.msra.mxu0 %v1118_v23  ;;  %v1468_v23 = vsel %vm410_vm0, %v3233_v21, 0 }
  0xae   :  { %2997 = vmatpush3.bf16.xpose.msra.mxu1 %v1290_v25  ;;  %3078 = vmatprep.subr.msk.bf16.mxu0 %vm410_vm0, %v3195_v24  ;;  %v1640_v24 = vsel %vm410_vm0, %v3234_v22, 0 }
  0xaf   :  { %3086 = vmatprep.subr.msk.bf16.mxu1 %vm410_vm0, %v3196_v26 }
  0xb5   :  { %2981 = vmatpush3.bf16.xpose.msra.mxu0 %v1121_v29 }
  0xb6   :  { %2999 = vmatpush3.bf16.xpose.msra.mxu1 %v1293_v31  ;;  %3079 = vmatprep.subr.msk.bf16.mxu0 %vm410_vm0, %v3199_v30 }
  0xb7   :  { %3087 = vmatprep.subr.msk.bf16.mxu1 %vm410_vm0, %v3200_v32 }
  0xbd   :  { %2983 = vmatpush3.bf16.xpose.msra.mxu0 %v1124_v35  ;;  %v4032_v35 = vld [vmem:[%s4683_s3 + $0x14] ss:$8 sps:$4 sm:$0xff]  }
  0xbe   :  { %3001 = vmatpush3.bf16.xpose.msra.mxu1 %v1296_v37  ;;  %3088 = vmatprep.subr.msk.bf16.mxu0 %vm410_vm0, %v3203_v36  ;;  %v4039_v36 = vld [vmem:[%s4683_s3 + $0x10] ss:$8 sps:$4 sm:$0xff]   ;;  %v4046_v37 = vld [vmem:[%s4683_s3 + $0x24] ss:$8 sps:$4 sm:$0xff]  }
  0xbf   :  { %3096 = vmatprep.subr.msk.bf16.mxu1 %vm410_vm0, %v3204_v38  ;;  %v4053_v38 = vld [vmem:[%s4683_s3 + $0x20] ss:$8 sps:$4 sm:$0xff]  }
  0xc4   :  { %2985 = vmatmul.mubr.msk.bf16.vlgmr.msra.gmra.mrb[8].mxu0 %vm410_vm0, %v3730_v55  ;;  %v3213_v55 = vld [vmem:[%s4680_s2 + $0x310] sm:$0xff]  }
  0xc5   :  { %3003 = vmatmul.mubr.msk.bf16.vlgmr.msra.gmra.mrb[8].mxu1 %vm410_vm0, %v3734_v56  ;;  %3005 = vmatpush3.bf16.xpose.msra.mxu0 %v1447_v43  ;;  %v3214_v56 = vld [vmem:[%s4680_s2 + $0x390] sm:$0xff]   ;;  %v1453_v57 = vsel %vm410_vm0, %v3213_v55, 0 }
  0xc6   :  { %3023 = vmatpush3.bf16.xpose.msra.mxu1 %v1619_v45  ;;  %3089 = vmatprep.subr.msk.bf16.mxu0 %vm410_vm0, %v3207_v44  ;;  %v1625_v59 = vsel %vm410_vm0, %v3214_v56, 0  ;;  %v4086_v43 = vld [vmem:[%s4683_s3 + $0x54] ss:$8 sps:$4 sm:$0xff]   ;;  %v4095_v44 = vld [vmem:[%s4683_s3 + $0x50] ss:$8 sps:$4 sm:$0xff]  }
  0xc7   :  { %3097 = vmatprep.subr.msk.bf16.mxu1 %vm410_vm0, %v3208_v46  ;;  %3020 = vmatprep.mubr.msk.bf16.mxu0 %vm410_vm0, %v3888_v47  ;;  %v4102_v45 = vld [vmem:[%s4683_s3 + $0x64] ss:$8 sps:$4 sm:$0xff]   ;;  %v4109_v46 = vld [vmem:[%s4683_s3 + $0x60] ss:$8 sps:$4 sm:$0xff]   ;;  %v4172_v55 = vld [vmem:[%s4683_s3 + $0xb4] ss:$8 sps:$4 sm:$0xff]  }
  0xc8   :  { %3038 = vmatprep.mubr.msk.bf16.mxu1 %vm410_vm0, %v3892_v48  ;;  %v4182_v56 = vld [vmem:[%s4683_s3 + $0xb0] ss:$8 sps:$4 sm:$0xff]  }
  0xcd   :  { %3007 = vmatpush3.bf16.xpose.msra.mxu0 %v1450_v51  ;;  %v4144_v51 = vld [vmem:[%s4683_s3 + $0x94] ss:$8 sps:$4 sm:$0xff]  }
  0xce   :  { %3025 = vmatpush3.bf16.xpose.msra.mxu1 %v1622_v53  ;;  %3090 = vmatprep.subr.msk.bf16.mxu0 %vm410_vm0, %v3211_v52  ;;  %v4151_v52 = vld [vmem:[%s4683_s3 + $0x90] ss:$8 sps:$4 sm:$0xff]   ;;  %v4158_v53 = vld [vmem:[%s4683_s3 + $0xa4] ss:$8 sps:$4 sm:$0xff]  }
  0xcf   :  { %3098 = vmatprep.subr.msk.bf16.mxu1 %vm410_vm0, %v3212_v54  ;;  %v4165_v54 = vld [vmem:[%s4683_s3 + $0xa0] ss:$8 sps:$4 sm:$0xff]  }
  0xd5   :  { %3009 = vmatpush3.bf16.xpose.msra.mxu0 %v1453_v57 }
  0xd6   :  { %3027 = vmatpush3.bf16.xpose.msra.mxu1 %v1625_v59  ;;  %3091 = vmatprep.subr.msk.bf16.mxu0 %vm410_vm0, %v3215_v58 }
  0xd7   :  { %3099 = vmatprep.subr.msk.bf16.mxu1 %vm410_vm0, %v3216_v60 }
  0xdd   :  { %3011 = vmatpush3.bf16.xpose.msra.mxu0 %v1456_v63 }
  0xde   :  { %3029 = vmatpush3.bf16.xpose.msra.mxu1 %v1628_v1  ;;  %3092 = vmatprep.subr.msk.bf16.mxu0 %vm410_vm0, %v3219_v0  ;;  %v4202_v1 = vld [vmem:[%s4683_s3 + $0xc0] ss:$8 sps:$4 sm:$0xff]  }
  0xdf   :  { %3100 = vmatprep.subr.msk.bf16.mxu1 %vm410_vm0, %v3220_v2 }
  0xe5   :  { %3013 = vmatpush3.bf16.xpose.msra.mxu0 %v1459_v5  ;;  %v4225_v5 = vld [vmem:[%s4683_s3 + $0xe4] ss:$8 sps:$4 sm:$0xff]  }
  0xe6   :  { %3031 = vmatpush3.bf16.xpose.msra.mxu1 %v1631_v7  ;;  %3093 = vmatprep.subr.msk.bf16.mxu0 %vm410_vm0, %v3223_v6  ;;  %v4230_v6 = vld [vmem:[%s4683_s3 + $0xe0] ss:$8 sps:$4 sm:$0xff]   ;;  %v4235_v7 = vld [vmem:[%s4683_s3 + $0xf4] ss:$8 sps:$4 sm:$0xff]  }
  0xe7   :  { %3101 = vmatprep.subr.msk.bf16.mxu1 %vm410_vm0, %v3224_v8  ;;  %v4243_v8 = vld [vmem:[%s4683_s3 + $0xf0] ss:$8 sps:$4 sm:$0xff]  }
  0xe8   :  { %4753 = vst [vmem:[#allocation3_spill] sm:$0xff] %v4243_v8 }
  0xed   :  { %3015 = vmatpush3.bf16.xpose.msra.mxu0 %v1462_v11 }
  0xee   :  { %3033 = vmatpush3.bf16.xpose.msra.mxu1 %v1634_v13  ;;  %3094 = vmatprep.subr.msk.bf16.mxu0 %vm410_vm0, %v3227_v12 }
  0xef   :  { %3102 = vmatprep.subr.msk.bf16.mxu1 %vm410_vm0, %v3228_v14 }
  0xf5   :  { %3017 = vmatpush3.bf16.xpose.msra.mxu0 %v1465_v17  ;;  %v1726_v17 = vpop.permute.xlu0 %1725 }
  0xf6   :  { %3035 = vmatpush3.bf16.xpose.msra.mxu1 %v1637_v19  ;;  %3095 = vmatprep.subr.msk.bf16.mxu0 %vm410_vm0, %v3231_v18  ;;  %v1736_v19 = vpop.permute.xlu1 %1735 }
  0xf7   :  { %3103 = vmatprep.subr.msk.bf16.mxu1 %vm410_vm0, %v3232_v20 }
  0xf9   :  { %v1731_v18 = vpop.permute.xlu0 %1730 }
  0xfd   :  { %3019 = vmatpush3.bf16.xpose.msra.mxu0 %v1468_v23 }
  0xfe   :  { %3037 = vmatpush3.bf16.xpose.msra.mxu1 %v1640_v24  ;;  %1991 = vmatprep.subr.bf16.mxu0 %v4021_v33 }
  0xff   :  { %2112 = vmatprep.subr.bf16.mxu1 %v4021_v33 }
 0x104   :  { %3021 = vmatmul.mubr.msk.bf16.vlgmr.msra.gmra.mrb[12].mxu0 %vm410_vm0, %v3888_v47  ;;  %v4116_v47 = vld [vmem:[%s4683_s3 + $0x74] ss:$8 sps:$4 sm:$0xff]  }
 0x105   :  { %3039 = vmatmul.mubr.msk.bf16.vlgmr.msra.gmra.mrb[12].mxu1 %vm410_vm0, %v3892_v48  ;;  %1992 = vmatpush1.bf16.msra.mxu0 %v4026_v34  ;;  %v4123_v48 = vld [vmem:[%s4683_s3 + $0x70] ss:$8 sps:$4 sm:$0xff]  }
 0x106   :  { %2113 = vmatpush1.bf16.msra.mxu1 %v4026_v34  ;;  %1993 = vmatprep.subr.bf16.mxu0 %v4032_v35 }
 0x107   :  { %2114 = vmatprep.subr.bf16.mxu1 %v4032_v35 }
 0x109   :  { %1994 = vmatpush1.bf16.msra.mxu0 %v4039_v36 }
 0x10a   :  { %2115 = vmatpush1.bf16.msra.mxu1 %v4039_v36  ;;  %1995 = vmatprep.subr.bf16.mxu0 %v4046_v37 }
 0x10b   :  { %2116 = vmatprep.subr.bf16.mxu1 %v4046_v37 }
 0x10d   :  { %1996 = vmatpush1.bf16.msra.mxu0 %v4053_v38 }
 0x10e   :  { %2117 = vmatpush1.bf16.msra.mxu1 %v4053_v38  ;;  %1997 = vmatprep.subr.bf16.mxu0 %v4060_v39 }
 0x10f   :  { %2118 = vmatprep.subr.bf16.mxu1 %v4060_v39 }
 0x111   :  { %1998 = vmatpush1.bf16.msra.mxu0 %v4067_v40 }
 0x112   :  { %2119 = vmatpush1.bf16.msra.mxu1 %v4067_v40  ;;  %1999 = vmatprep.subr.bf16.mxu0 %v4074_v41 }
 0x113   :  { %2120 = vmatprep.subr.bf16.mxu1 %v4074_v41 }
 0x115   :  { %2000 = vmatpush1.bf16.msra.mxu0 %v4080_v42 }
 0x116   :  { %2121 = vmatpush1.bf16.msra.mxu1 %v4080_v42  ;;  %2001 = vmatprep.subr.bf16.mxu0 %v4086_v43 }
 0x117   :  { %v4010_v25 = vpop.f32.mrb[0].mxu0  ;;  %2122 = vmatprep.subr.bf16.mxu1 %v4086_v43 }
 0x118   :  { %v4012_v26 = vpop.f32.mrb[0].mxu1  ;;  %v4014_v27 = vpop.f32.mrb[1].mxu0  ;;  %v1763_v20 = vmul.f32 %v1726_v17, %v4010_v25 }
 0x119   :  { %v4016_v28 = vpop.f32.mrb[1].mxu1  ;;  %v500_v29 = vpop.f32.mrb[2].mxu0  ;;  %2002 = vmatpush1.bf16.msra.mxu0 %v4095_v44  ;;  %v1765_v21 = vmul.f32 %v1731_v18, %v4012_v26  ;;  %v1764_v22 = vmul.f32 %v1726_v17, %v4014_v27 }
 0x11a   :  { %v672_v30 = vpop.f32.mrb[2].mxu1  ;;  %v501_v31 = vpop.f32.mrb[3].mxu0  ;;  %2123 = vmatpush1.bf16.msra.mxu1 %v4095_v44  ;;  %2003 = vmatprep.subr.bf16.mxu0 %v4102_v45  ;;  %v1766_v23 = vmul.f32 %v1731_v18, %v4016_v28 }
 0x11b   :  { %v673_v32 = vpop.f32.mrb[3].mxu1  ;;  %2124 = vmatprep.subr.bf16.mxu1 %v4102_v45  ;;  %v1741_v30 = vpop.permute.xlu1 %1740  ;;  %v1779_v31 = vpack.c.bf16 %v1763_v20, %v1763_v20 }
 0x11c   :  { %v1781_v32 = vpack.c.bf16 %v1765_v21, %v1765_v21 }
 0x11d   :  { %2004 = vmatpush1.bf16.msra.mxu0 %v4109_v46 }
 0x11e   :  { %2125 = vmatpush1.bf16.msra.mxu1 %v4109_v46  ;;  %2005 = vmatprep.subr.bf16.mxu0 %v4116_v47  ;;  %v4270_v17 = vunpack.c.l.bf16 %v1781_v32 }
 0x11f   :  { %2126 = vmatprep.subr.bf16.mxu1 %v4116_v47  ;;  %v1751_v21 = vpop.permute.xlu1 %1750 }
 0x120   :  { %4758 = vst [vmem:[#allocation8_spill] sm:$0xff] %v4270_v17 }
 0x121   :  { %2006 = vmatpush1.bf16.msra.mxu0 %v4123_v48 }
 0x122   :  { %2127 = vmatpush1.bf16.msra.mxu1 %v4123_v48  ;;  %2007 = vmatprep.subr.bf16.mxu0 %v4130_v49 }
 0x123   :  { %2128 = vmatprep.subr.bf16.mxu1 %v4130_v49 }
 0x125   :  { %2008 = vmatpush1.bf16.msra.mxu0 %v4137_v50 }
 0x126   :  { %2129 = vmatpush1.bf16.msra.mxu1 %v4137_v50  ;;  %2009 = vmatprep.subr.bf16.mxu0 %v4144_v51 }
 0x127   :  { %2130 = vmatprep.subr.bf16.mxu1 %v4144_v51 }
 0x129   :  { %2010 = vmatpush1.bf16.msra.mxu0 %v4151_v52 }
 0x12a   :  { %2131 = vmatpush1.bf16.msra.mxu1 %v4151_v52  ;;  %2011 = vmatprep.subr.bf16.mxu0 %v4158_v53 }
 0x12b   :  { %2132 = vmatprep.subr.bf16.mxu1 %v4158_v53 }
 0x12d   :  { %2012 = vmatpush1.bf16.msra.mxu0 %v4165_v54 }
 0x12e   :  { %2133 = vmatpush1.bf16.msra.mxu1 %v4165_v54  ;;  %2013 = vmatprep.subr.bf16.mxu0 %v4172_v55 }
 0x12f   :  { %2134 = vmatprep.subr.bf16.mxu1 %v4172_v55 }
 0x131   :  { %2014 = vmatpush1.bf16.msra.mxu0 %v4182_v56 }
 0x132   :  { %2135 = vmatpush1.bf16.msra.mxu1 %v4182_v56  ;;  %2015 = vmatprep.subr.bf16.mxu0 %v4197_v62 }
 0x133   :  { %2136 = vmatprep.subr.bf16.mxu1 %v4197_v62 }
 0x135   :  { %2016 = vmatpush1.bf16.msra.mxu0 %v4202_v1 }
 0x136   :  { %2137 = vmatpush1.bf16.msra.mxu1 %v4202_v1  ;;  %2017 = vmatprep.subr.bf16.mxu0 %v4211_v3 }
 0x137   :  { %2138 = vmatprep.subr.bf16.mxu1 %v4211_v3 }
 0x139   :  { %2018 = vmatpush1.bf16.msra.mxu0 %v4216_v4 }
 0x13a   :  { %2139 = vmatpush1.bf16.msra.mxu1 %v4216_v4  ;;  %2019 = vmatprep.subr.bf16.mxu0 %v4225_v5 }
 0x13b   :  { %2140 = vmatprep.subr.bf16.mxu1 %v4225_v5 }
 0x13d   :  { %2020 = vmatpush1.bf16.msra.mxu0 %v4230_v6 }
 0x13e   :  { %2141 = vmatpush1.bf16.msra.mxu1 %v4230_v6  ;;  %2021 = vmatprep.subr.bf16.mxu0 %v4235_v7 }
 0x13f   :  { %2142 = vmatprep.subr.bf16.mxu1 %v4235_v7 }
 0x141   :  { %2022 = vmatpush1.bf16.msra.mxu0 %v4243_v8 }
 0x142   :  { %2143 = vmatpush1.bf16.msra.mxu1 %v4243_v8  ;;  %2313 = vmatprep.subr.bf16.mxu0 %v4021_v33 }
 0x143   :  { %2434 = vmatprep.subr.bf16.mxu1 %v4021_v33 }
 0x157   :  { %v4184_v57 = vpop.f32.mrb[4].mxu0 }
 0x158   :  { %4752 = vst [vmem:[#allocation2_spill] sm:$0xff] %v4184_v57  ;;  %v4186_v58 = vpop.f32.mrb[4].mxu1  ;;  %v4188_v59 = vpop.f32.mrb[5].mxu0  ;;  %v1767_v24 = vmul.f32 %v1736_v19, %v4184_v57 }
 0x159   :  { %v4192_v60 = vpop.f32.mrb[5].mxu1  ;;  %v844_v61 = vpop.f32.mrb[6].mxu0  ;;  %v1768_v29 = vmul.f32 %v1736_v19, %v4188_v59 }
 0x15a   :  { %v1016_v63 = vpop.f32.mrb[6].mxu1  ;;  %v845_v0 = vpop.f32.mrb[7].mxu0  ;;  %v1780_v61 = vpack.c.bf16 %v1764_v22, %v1764_v22 }
 0x15b   :  { %v1017_v2 = vpop.f32.mrb[7].mxu1  ;;  %v1782_v63 = vpack.c.bf16 %v1766_v23, %v1766_v23  ;;  %v1746_v0 = vpop.permute.xlu0 %1745 }
 0x15c   :  { %v1783_v2 = vpack.c.bf16 %v1767_v24, %v1767_v24  ;;  %v4273_v57 = vunpack.c.l.bf16 %v1780_v61 }
 0x15d   :  { %v4275_v19 = vunpack.c.l.bf16 %v1782_v63 }
 0x15e   :  { %4759 = vst [vmem:[#allocation9_spill] sm:$0xff] %v4273_v57  ;;  %v4278_v22 = vunpack.c.l.bf16 %v1783_v2 }
 0x15f   :  { %4760 = vst [vmem:[#allocation10_spill] sm:$0xff] %v4275_v19  ;;  %v1818_v61 = vadd.f32 %v4275_v19, %v4273_v57  ;;  %v1756_v19 = vpop.permute.xlu0 %1755 }
 0x160   :  { %4761 = vst [vmem:[#allocation11_spill] sm:$0xff] %v4278_v22 }
 0x197   :  { %v4252_v9 = vpop.f32.mrb[8].mxu0 }
 0x198   :  { %4754 = vst [vmem:[#allocation4_spill] sm:$0xff] %v4252_v9  ;;  %v4254_v10 = vpop.f32.mrb[8].mxu1  ;;  %v4256_v11 = vpop.f32.mrb[9].mxu0  ;;  %v1771_v18 = vmul.f32 %v1746_v0, %v4252_v9 }
 0x199   :  { %4755 = vst [vmem:[#allocation5_spill] sm:$0xff] %v4254_v10  ;;  %v4258_v12 = vpop.f32.mrb[9].mxu1  ;;  %v1188_v13 = vpop.f32.mrb[10].mxu0  ;;  %v1772_v20 = vmul.f32 %v1746_v0, %v4256_v11  ;;  %v1773_v32 = vmul.f32 %v1751_v21, %v4254_v10 }
 0x19a   :  { %4756 = vst [vmem:[#allocation6_spill] sm:$0xff] %v4258_v12  ;;  %v1360_v14 = vpop.f32.mrb[10].mxu1  ;;  %v1189_v15 = vpop.f32.mrb[11].mxu0  ;;  %v1769_v13 = vmul.f32 %v1741_v30, %v4186_v58  ;;  %v1774_v9 = vmul.f32 %v1751_v21, %v4258_v12 }
 0x19b   :  { %v1361_v16 = vpop.f32.mrb[11].mxu1  ;;  %v1784_v14 = vpack.c.bf16 %v1768_v29, %v1768_v29  ;;  %v1770_v15 = vmul.f32 %v1741_v30, %v4192_v60  ;;  %v1788_v63 = vpack.c.bf16 %v1772_v20, %v1772_v20  ;;  %v1761_v21 = vpop.permute.xlu1 %1760 }
 0x19c   :  { %v4268_v16 = vunpack.c.l.bf16 %v1779_v31  ;;  %v1785_v23 = vpack.c.bf16 %v1769_v13, %v1769_v13  ;;  %v1787_v31 = vpack.c.bf16 %v1771_v18, %v1771_v18 }
 0x19d   :  { %v4280_v24 = vunpack.c.l.bf16 %v1784_v14  ;;  %v1786_v29 = vpack.c.bf16 %v1770_v15, %v1770_v15  ;;  %v4296_v18 = vunpack.c.l.bf16 %v1788_v63 }
 0x19e   :  { %4757 = vst [vmem:[#allocation7_spill] sm:$0xff] %v4268_v16  ;;  %v1811_v30 = vadd.f32 %v4270_v17, %v4268_v16  ;;  %v4289_v2 = vunpack.c.l.bf16 %v1785_v23  ;;  %v4294_v15 = vunpack.c.l.bf16 %v1787_v31  ;;  %v1789_v17 = vpack.c.bf16 %v1773_v32, %v1773_v32 }
 0x19f   :  { %4762 = vst [vmem:[#allocation12_spill] sm:$0xff] %v4280_v24  ;;  %v1819_v13 = vadd.f32 %v1818_v61, %v4280_v24  ;;  %v4292_v14 = vunpack.c.l.bf16 %v1786_v29  ;;  %4766 = vst [vmem:[#allocation16_spill] sm:$0xff] %v4296_v18  ;;  %v1790_v16 = vpack.c.bf16 %v1774_v9, %v1774_v9 }
 0x1a0   :  { %v1812_v0 = vadd.f32 %v1811_v30, %v4278_v22  ;;  %4763 = vst [vmem:[#allocation13_spill] sm:$0xff] %v4289_v2  ;;  %4765 = vst [vmem:[#allocation15_spill] sm:$0xff] %v4294_v15  ;;  %v4303_v30 = vunpack.c.l.bf16 %v1789_v17 }
 0x1a1   :  { %4764 = vst [vmem:[#allocation14_spill] sm:$0xff] %v4292_v14  ;;  %v1820_v20 = vadd.f32 %v1819_v13, %v4292_v14  ;;  %v4311_v61 = vunpack.c.l.bf16 %v1790_v16 }
 0x1a2   :  { %v1813_v10 = vadd.f32 %v1812_v0, %v4289_v2 }
 0x1a3   :  { %v1821_v9 = vadd.f32 %v1820_v20, %v4296_v18  ;;  %4769 = vst [vmem:[#allocation19_spill] sm:$0xff] %v4311_v61 }
 0x1a4   :  { %v1814_v23 = vadd.f32 %v1813_v10, %v4294_v15 }
 0x1a5   :  { %v1822_v18 = vadd.f32 %v1821_v9, %v4311_v61 }
 0x1a6   :  { %v1815_v12 = vadd.f32 %v1814_v23, %v4303_v30 }
 0x1d7   :  { %v4300_v57 = vpop.f32.mrb[12].mxu0 }
 0x1d8   :  { %4767 = vst [vmem:[#allocation17_spill] sm:$0xff] %v4300_v57  ;;  %v1775_v29 = vmul.f32 %v1756_v19, %v4300_v57  ;;  %v4306_v31 = vpop.f32.mrb[12].mxu1  ;;  %v4308_v32 = vpop.f32.mrb[13].mxu0 }
 0x1d9   :  { %4768 = vst [vmem:[#allocation18_spill] sm:$0xff] %v4306_v31  ;;  %v1777_v63 = vmul.f32 %v1761_v21, %v4306_v31  ;;  %v1776_v0 = vmul.f32 %v1756_v19, %v4308_v32  ;;  %v4315_v13 = vpop.f32.mrb[13].mxu1  ;;  %v1532_v14 = vpop.f32.mrb[14].mxu0 }
 0x1da   :  { %v1791_v10 = vpack.c.bf16 %v1775_v29, %v1775_v29  ;;  %v1778_v17 = vmul.f32 %v1761_v21, %v4315_v13  ;;  %v1704_v15 = vpop.f32.mrb[14].mxu1  ;;  %v1533_v24 = vpop.f32.mrb[15].mxu0 }
 0x1db   :  { %v1793_v2 = vpack.c.bf16 %v1777_v63, %v1777_v63  ;;  %v1792_v22 = vpack.c.bf16 %v1776_v0, %v1776_v0  ;;  %v1705_v57 = vpop.f32.mrb[15].mxu1 }
 0x1dc   :  { %v4319_v20 = vunpack.c.l.bf16 %v1791_v10  ;;  %v1794_v16 = vpack.c.bf16 %v1778_v17, %v1778_v17 }
 0x1dd   :  { %v4322_v31 = vunpack.c.l.bf16 %v1792_v22  ;;  %v4325_v14 = vunpack.c.l.bf16 %v1793_v2 }
 0x1de   :  { %v1816_v19 = vadd.f32 %v1815_v12, %v4319_v20  ;;  %v4328_v15 = vunpack.c.l.bf16 %v1794_v16 }
 0x1df   :  { %4770 = vst [vmem:[#allocation20_spill] sm:$0xff] %v4322_v31  ;;  %4771 = vst [vmem:[#allocation21_spill] sm:$0xff] %v4325_v14  ;;  %v1823_v21 = vadd.f32 %v1822_v18, %v4322_v31 }
 0x1e0   :  { %4772 = vst [vmem:[#allocation22_spill] sm:$0xff] %v4328_v15  ;;  %v1817_v24 = vadd.f32 %v1816_v19, %v4325_v14 }
 0x1e1   :  { %v1824_v57 = vadd.f32 %v1823_v21, %v4328_v15 }
 0x1e2   :  { %v1825_v23 = vmul.f32 0.125, %v1817_v24 }
 0x1e3   :  { %v1826_v29 = vmul.f32 0.125, %v1824_v57 }
 0x1e4   :  { %v1827_v63 = vmul.f32 %v1825_v23, %v1825_v23 }
 0x1e5   :  { %v1828_v0 = vmul.f32 %v1826_v29, %v1826_v29 }
 0x1e6   :  { %v1829_v9 = vpack.c.bf16 %v1827_v63, %v1827_v63 }
 0x1e7   :  { %v1830_v10 = vpack.c.bf16 %v1828_v0, %v1828_v0 }
 0x1e9   :  { %2023 = vmatprep.mubr.bf16.mxu0 %v1830_v10 }
 0x1ea   :  { %2024 = vmatmul.mubr.bf16.vlgmr.msra.gmra.mrb[16].mxu0 %v1829_v9 }
 0x1eb   :  { %2314 = vmatpush1.bf16.msra.mxu0 %v4026_v34 }
 0x1ec   :  { %2315 = vmatprep.subr.bf16.mxu0 %v4032_v35 }
 0x1ef   :  { %2316 = vmatpush1.bf16.msra.mxu0 %v4039_v36 }
 0x1f0   :  { %2317 = vmatprep.subr.bf16.mxu0 %v4046_v37 }
 0x1f3   :  { %2318 = vmatpush1.bf16.msra.mxu0 %v4053_v38 }
 0x1f4   :  { %2319 = vmatprep.subr.bf16.mxu0 %v4060_v39 }
 0x1f7   :  { %2320 = vmatpush1.bf16.msra.mxu0 %v4067_v40 }
 0x1f8   :  { %2321 = vmatprep.subr.bf16.mxu0 %v4074_v41 }
 0x1fb   :  { %2322 = vmatpush1.bf16.msra.mxu0 %v4080_v42 }
 0x1fc   :  { %2323 = vmatprep.subr.bf16.mxu0 %v4086_v43 }
 0x1ff   :  { %2324 = vmatpush1.bf16.msra.mxu0 %v4095_v44 }
 0x200   :  { %2325 = vmatprep.subr.bf16.mxu0 %v4102_v45 }
 0x203   :  { %2326 = vmatpush1.bf16.msra.mxu0 %v4109_v46 }
 0x204   :  { %2327 = vmatprep.subr.bf16.mxu0 %v4116_v47 }
 0x207   :  { %2328 = vmatpush1.bf16.msra.mxu0 %v4123_v48 }
 0x208   :  { %2329 = vmatprep.subr.bf16.mxu0 %v4130_v49 }
 0x20b   :  { %2330 = vmatpush1.bf16.msra.mxu0 %v4137_v50 }
 0x20c   :  { %2331 = vmatprep.subr.bf16.mxu0 %v4144_v51 }
 0x20f   :  { %2332 = vmatpush1.bf16.msra.mxu0 %v4151_v52 }
 0x210   :  { %2333 = vmatprep.subr.bf16.mxu0 %v4158_v53 }
 0x213   :  { %2334 = vmatpush1.bf16.msra.mxu0 %v4165_v54 }
 0x214   :  { %2335 = vmatprep.subr.bf16.mxu0 %v4172_v55 }
 0x217   :  { %2336 = vmatpush1.bf16.msra.mxu0 %v4182_v56 }
 0x218   :  { %2337 = vmatprep.subr.bf16.mxu0 %v4197_v62 }
 0x21b   :  { %2338 = vmatpush1.bf16.msra.mxu0 %v4202_v1 }
 0x21c   :  { %2339 = vmatprep.subr.bf16.mxu0 %v4211_v3 }
 0x21f   :  { %2340 = vmatpush1.bf16.msra.mxu0 %v4216_v4 }
 0x220   :  { %2341 = vmatprep.subr.bf16.mxu0 %v4225_v5 }
 0x223   :  { %2342 = vmatpush1.bf16.msra.mxu0 %v4230_v6 }
 0x224   :  { %2343 = vmatprep.subr.bf16.mxu0 %v4235_v7 }
 0x227   :  { %2344 = vmatpush1.bf16.msra.mxu0 %v4243_v8 }
 0x228   :  { %2651 = vmatprep.subr.bf16.mxu0 %v4021_v33 }
 0x2bd   :  { %v2025_v12 = vpop.f32.mrb[16].mxu0 }
 0x2be   :  { %v2032_v22 = vadd.f32 1.0, %v2025_v12  ;;  %v2038_v2 = vadd.f32 1e-09, %v2025_v12  ;;  %v2027_v18 = vpop.f32.mrb[17].mxu0 }
 0x2bf   :  { %v2033_v17 = vadd.f32 1.0, %v2027_v18  ;;  %v2029_v16 = vpop.f32.mrb[18].mxu0  ;;  %v2039_v19 = vadd.f32 1e-09, %v2027_v18 }
 0x2c0   :  { %3283 = vrcp.f32 %v2032_v22  ;;  %v2030_v21 = vpop.f32.mrb[19].mxu0  ;;  %v4366_v16 = vpack.c.bf16 %v4010_v25, %v4010_v25  ;;  %v4370_v22 = vpack.c.bf16 %v4012_v26, %v4012_v26  ;;  %v4386_v25 = vpack.c.bf16 %v4192_v60, %v4192_v60 }
 0x2c1   :  { %3285 = vrsqrt.f32 %v2038_v2  ;;  %v4374_v2 = vpack.c.bf16 %v4014_v27, %v4014_v27  ;;  %v4400_v21 = vpack.c.bf16 %v4186_v58, %v4186_v58 }
 0x2c2   :  { %3287 = vrcp.f32 %v2033_v17  ;;  %4773 = vst [vmem:[#allocation23_spill] sm:$0xff] %v4366_v16  ;;  %4774 = vst [vmem:[#allocation24_spill] sm:$0xff] %v4370_v22 }
 0x2c3   :  { %3289 = vrsqrt.f32 %v2039_v19  ;;  %4775 = vst [vmem:[#allocation25_spill] sm:$0xff] %v4374_v2  ;;  %4778 = vst [vmem:[#allocation28_spill] sm:$0xff] %v4386_v25  ;;  %v4779_v19 = vld [vmem:[#allocation2_spill] sm:$0xff] }
 0x2c4   :  { %v4396_v60 = vpack.c.bf16 %v4779_v19, %v4779_v19  ;;  %4781 = vst [vmem:[#allocation29_spill] sm:$0xff] %v4400_v21 }
 0x2c6   :  { %4780 = vst [vmem:[#allocation2_spill] sm:$0xff] %v4396_v60 }
 0x2ca   :  { %v3284_v24 = vpop.eup %3283 }
 0x2cb   :  { %v3286_v57 = vpop.eup %3285  ;;  %v2036_v63 = vmul.f32 %v3284_v24, %v2025_v12  ;;  %v4378_v12 = vpack.c.bf16 %v4016_v28, %v4016_v28  ;;  %v4404_v24 = vpack.c.bf16 %v4256_v11, %v4256_v11 }
 0x2cc   :  { %v3288_v0 = vpop.eup %3287 }
 0x2cd   :  { %v2042_v10 = vmul.f32 %v3286_v57, %v2036_v63  ;;  %v2037_v9 = vmul.f32 %v3288_v0, %v2027_v18  ;;  %v3290_v15 = vpop.eup %3289  ;;  %4776 = vst [vmem:[#allocation26_spill] sm:$0xff] %v4378_v12  ;;  %4782 = vst [vmem:[#allocation30_spill] sm:$0xff] %v4404_v24  ;;  %v4783_v57 = vld [vmem:[#allocation6_spill] sm:$0xff] }
 0x2ce   :  { %v4408_v63 = vpack.c.bf16 %v4783_v57, %v4783_v57 }
 0x2cf   :  { %v2044_v33 = vmul.f32 %v2042_v10, %v1825_v23  ;;  %v2043_v31 = vmul.f32 %v3290_v15, %v2037_v9  ;;  %v4382_v15 = vpack.c.bf16 %v4188_v59, %v4188_v59 }
 0x2d0   :  { %4784 = vst [vmem:[#allocation6_spill] sm:$0xff] %v4408_v63 }
 0x2d1   :  { %v2046_v14 = vpack.c.bf16 %v2044_v33, %v2044_v33  ;;  %v2045_v61 = vmul.f32 %v2043_v31, %v1826_v29  ;;  %4777 = vst [vmem:[#allocation27_spill] sm:$0xff] %v4382_v15 }
 0x2d3   :  { %v2047_v31 = vpack.c.bf16 %v2045_v61, %v2045_v61  ;;  %v2048_v26 = vmul.bf16 %v2046_v14, %v4366_v16  ;;  %v2050_v23 = vmul.bf16 %v2046_v14, %v4370_v22  ;;  %v2052_v0 = vmul.bf16 %v2046_v14, %v4396_v60 }
 0x2d4   :  { %v2054_v10 = vmul.bf16 %v2046_v14, %v4400_v21 }
 0x2d5   :  { %v2049_v27 = vmul.bf16 %v2047_v31, %v4374_v2  ;;  %v2051_v29 = vmul.bf16 %v2047_v31, %v4378_v12  ;;  %v2053_v28 = vmul.bf16 %v2047_v31, %v4382_v15  ;;  %v2055_v18 = vmul.bf16 %v2047_v31, %v4386_v25  ;;  %v4813_v2 = vld [vmem:[#allocation11_spill] sm:$0xff] }
 0x2d6   :  { %v2880_v59 = vcombine.low %v2048_v26, %v2050_v23  ;;  %v2057_v58 = vmul.bf16 %v2047_v31, %v4404_v24  ;;  %v2059_v9 = vmul.bf16 %v2047_v31, %v4408_v63  ;;  %v2882_v11 = vcombine.low %v2052_v0, %v2054_v10  ;;  %v4785_v26 = vld [vmem:[#allocation4_spill] sm:$0xff] }
 0x2d7   :  { %v2881_v17 = vcombine.low %v2049_v27, %v2051_v29  ;;  %v2883_v61 = vcombine.low %v2053_v28, %v2055_v18  ;;  %v4420_v23 = vpack.c.bf16 %v4785_v26, %v4785_v26 }
 0x2d8   :  { %v2885_v33 = vcombine.low %v2057_v58, %v2059_v9 }
 0x2d9   :  { %2144 = vmatprep.mubr.bf16.mxu1 %v2881_v17  ;;  %4786 = vst [vmem:[#allocation4_spill] sm:$0xff] %v4420_v23  ;;  %v4791_v17 = vld [vmem:[#allocation17_spill] sm:$0xff] }
 0x2da   :  { %2145 = vmatmul.mubr.bf16.vlgmr.msra.gmra.mrb[16].mxu1 %v2880_v59  ;;  %v4444_v59 = vpack.c.bf16 %v4791_v17, %v4791_v17 }
 0x2db   :  { %2154 = vmatprep.mubr.bf16.mxu1 %v2883_v61  ;;  %2435 = vmatpush1.bf16.msra.mxu1 %v4026_v34  ;;  %v4787_v34 = vld [vmem:[#allocation5_spill] sm:$0xff] }
 0x2dc   :  { %2436 = vmatprep.subr.bf16.mxu1 %v4032_v35  ;;  %v4424_v27 = vpack.c.bf16 %v4787_v34, %v4787_v34  ;;  %v4428_v35 = vpack.c.bf16 %v4308_v32, %v4308_v32  ;;  %4792 = vst [vmem:[#allocation17_spill] sm:$0xff] %v4444_v59 }
 0x2de   :  { %4788 = vst [vmem:[#allocation5_spill] sm:$0xff] %v4424_v27  ;;  %4789 = vst [vmem:[#allocation31_spill] sm:$0xff] %v4428_v35  ;;  %v2058_v29 = vmul.bf16 %v2046_v14, %v4424_v27  ;;  %v2061_v28 = vmul.bf16 %v2047_v31, %v4428_v35 }
 0x2df   :  { %2437 = vmatpush1.bf16.msra.mxu1 %v4039_v36  ;;  %v4432_v36 = vpack.c.bf16 %v4315_v13, %v4315_v13 }
 0x2e0   :  { %2438 = vmatprep.subr.bf16.mxu1 %v4046_v37  ;;  %v2056_v37 = vmul.bf16 %v2046_v14, %v4420_v23 }
 0x2e1   :  { %4790 = vst [vmem:[#allocation32_spill] sm:$0xff] %v4432_v36  ;;  %v2063_v18 = vmul.bf16 %v2047_v31, %v4432_v36  ;;  %v2060_v31 = vmul.bf16 %v2046_v14, %v4444_v59 }
 0x2e2   :  { %2155 = vmatmul.mubr.bf16.gmra.mrb[20].mxu1 %v2882_v11  ;;  %v2884_v32 = vcombine.low %v2056_v37, %v2058_v29 }
 0x2e3   :  { %2164 = vmatprep.mubr.bf16.mxu1 %v2885_v33  ;;  %2439 = vmatpush1.bf16.msra.mxu1 %v4053_v38  ;;  %v2887_v13 = vcombine.low %v2061_v28, %v2063_v18  ;;  %v4793_v38 = vld [vmem:[#allocation18_spill] sm:$0xff] }
 0x2e4   :  { %2440 = vmatprep.subr.bf16.mxu1 %v4060_v39  ;;  %v4448_v61 = vpack.c.bf16 %v4793_v38, %v4793_v38 }
 0x2e6   :  { %4794 = vst [vmem:[#allocation18_spill] sm:$0xff] %v4448_v61  ;;  %v2062_v19 = vmul.bf16 %v2046_v14, %v4448_v61 }
 0x2e7   :  { %2441 = vmatpush1.bf16.msra.mxu1 %v4067_v40 }
 0x2e8   :  { %2442 = vmatprep.subr.bf16.mxu1 %v4074_v41  ;;  %v2886_v57 = vcombine.low %v2060_v31, %v2062_v19 }
 0x2ea   :  { %2165 = vmatmul.mubr.bf16.gmra.mrb[24].mxu1 %v2884_v32 }
 0x2eb   :  { %2174 = vmatprep.mubr.bf16.mxu1 %v2887_v13  ;;  %2443 = vmatpush1.bf16.msra.mxu1 %v4080_v42 }
 0x2ec   :  { %2444 = vmatprep.subr.bf16.mxu1 %v4086_v43 }
 0x2ef   :  { %2445 = vmatpush1.bf16.msra.mxu1 %v4095_v44 }
 0x2f0   :  { %2446 = vmatprep.subr.bf16.mxu1 %v4102_v45 }
 0x2f2   :  { %2175 = vmatmul.mubr.bf16.gmra.mrb[28].mxu1 %v2886_v57 }
 0x2f3   :  { %2447 = vmatpush1.bf16.msra.mxu1 %v4109_v46 }
 0x2f4   :  { %2448 = vmatprep.subr.bf16.mxu1 %v4116_v47 }
 0x2f7   :  { %2449 = vmatpush1.bf16.msra.mxu1 %v4123_v48 }
 0x2f8   :  { %2450 = vmatprep.subr.bf16.mxu1 %v4130_v49 }
 0x2fb   :  { %2451 = vmatpush1.bf16.msra.mxu1 %v4137_v50 }
 0x2fc   :  { %2452 = vmatprep.subr.bf16.mxu1 %v4144_v51 }
 0x2ff   :  { %2453 = vmatpush1.bf16.msra.mxu1 %v4151_v52 }
 0x300   :  { %2454 = vmatprep.subr.bf16.mxu1 %v4158_v53 }
 0x303   :  { %2455 = vmatpush1.bf16.msra.mxu1 %v4165_v54 }
 0x304   :  { %2456 = vmatprep.subr.bf16.mxu1 %v4172_v55 }
 0x307   :  { %2457 = vmatpush1.bf16.msra.mxu1 %v4182_v56 }
 0x308   :  { %2458 = vmatprep.subr.bf16.mxu1 %v4197_v62 }
 0x30b   :  { %2459 = vmatpush1.bf16.msra.mxu1 %v4202_v1 }
 0x30c   :  { %2460 = vmatprep.subr.bf16.mxu1 %v4211_v3 }
 0x30f   :  { %2461 = vmatpush1.bf16.msra.mxu1 %v4216_v4 }
 0x310   :  { %2462 = vmatprep.subr.bf16.mxu1 %v4225_v5 }
 0x313   :  { %2463 = vmatpush1.bf16.msra.mxu1 %v4230_v6 }
 0x314   :  { %2464 = vmatprep.subr.bf16.mxu1 %v4235_v7 }
 0x317   :  { %2465 = vmatpush1.bf16.msra.mxu1 %v4243_v8 }
 0x3ad   :  { %v4475_v14 = vpop.f32.mrb[16].mxu1 }
 0x3ae   :  { %4795 = vst [vmem:[#allocation33_spill] sm:$0xff] %v4475_v14  ;;  %v4477_v0 = vpop.f32.mrb[17].mxu1 }
 0x3af   :  { %4796 = vst [vmem:[#allocation34_spill] sm:$0xff] %v4477_v0  ;;  %v4479_v10 = vpop.f32.mrb[18].mxu1 }
 0x3b0   :  { %4797 = vst [vmem:[#allocation35_spill] sm:$0xff] %v4479_v10  ;;  %v4481_v58 = vpop.f32.mrb[19].mxu1 }
 0x3b1   :  { %4798 = vst [vmem:[#allocation36_spill] sm:$0xff] %v4481_v58 }
 0x3b5   :  { %v4483_v9 = vpop.f32.mrb[20].mxu1 }
 0x3b6   :  { %4799 = vst [vmem:[#allocation37_spill] sm:$0xff] %v4483_v9  ;;  %v2185_v11 = vmax.f32 %v4475_v14, %v4483_v9  ;;  %v4487_v33 = vpop.f32.mrb[21].mxu1 }
 0x3b7   :  { %4800 = vst [vmem:[#allocation38_spill] sm:$0xff] %v4487_v33  ;;  %v2192_v26 = vmax.f32 %v4477_v0, %v4487_v33  ;;  %v4491_v34 = vpop.f32.mrb[22].mxu1 }
 0x3b8   :  { %4801 = vst [vmem:[#allocation39_spill] sm:$0xff] %v4491_v34  ;;  %v2186_v37 = vmax.f32 %v4479_v10, %v4491_v34  ;;  %v4495_v29 = vpop.f32.mrb[23].mxu1 }
 0x3b9   :  { %4802 = vst [vmem:[#allocation40_spill] sm:$0xff] %v4495_v29  ;;  %v2193_v28 = vmax.f32 %v4481_v58, %v4495_v29 }
 0x3bd   :  { %v4499_v18 = vpop.f32.mrb[24].mxu1 }
 0x3be   :  { %4803 = vst [vmem:[#allocation41_spill] sm:$0xff] %v4499_v18  ;;  %v2187_v32 = vmax.f32 %v2185_v11, %v4499_v18  ;;  %v4502_v13 = vpop.f32.mrb[25].mxu1 }
 0x3bf   :  { %4804 = vst [vmem:[#allocation42_spill] sm:$0xff] %v4502_v13  ;;  %v2194_v17 = vmax.f32 %v2192_v26, %v4502_v13  ;;  %v4505_v38 = vpop.f32.mrb[26].mxu1 }
 0x3c0   :  { %4805 = vst [vmem:[#allocation43_spill] sm:$0xff] %v4505_v38  ;;  %v2188_v31 = vmax.f32 %v2186_v37, %v4505_v38  ;;  %v4508_v19 = vpop.f32.mrb[27].mxu1 }
 0x3c1   :  { %4806 = vst [vmem:[#allocation44_spill] sm:$0xff] %v4508_v19  ;;  %v2195_v57 = vmax.f32 %v2193_v28, %v4508_v19 }
 0x3c5   :  { %v4511_v61 = vpop.f32.mrb[28].mxu1 }
 0x3c6   :  { %4807 = vst [vmem:[#allocation45_spill] sm:$0xff] %v4511_v61  ;;  %v2189_v59 = vmax.f32 %v2187_v32, %v4511_v61  ;;  %v4514_v36 = vpop.f32.mrb[29].mxu1 }
 0x3c7   :  { %4808 = vst [vmem:[#allocation46_spill] sm:$0xff] %v4514_v36  ;;  %v2196_v11 = vmax.f32 %v2194_v17, %v4514_v36  ;;  %v4517_v35 = vpop.f32.mrb[30].mxu1 }
 0x3c8   :  { %4809 = vst [vmem:[#allocation47_spill] sm:$0xff] %v4517_v35  ;;  %v2190_v26 = vmax.f32 %v2188_v31, %v4517_v35  ;;  %v4520_v27 = vpop.f32.mrb[31].mxu1 }
 0x3c9   :  { %4810 = vst [vmem:[#allocation48_spill] sm:$0xff] %v4520_v27  ;;  %v2197_v37 = vmax.f32 %v2195_v57, %v4520_v27 }
 0x3ca   :  { %v2191_v23 = vmax.f32 %v2189_v59, %v2190_v26 }
 0x3cb   :  { %v2198_v63 = vmax.f32 %v2196_v11, %v2197_v37 }
 0x3cc   :  { %v2199_v28 = vsub.f32 %v4475_v14, %v2191_v23  ;;  %v2201_v24 = vsub.f32 %v4479_v10, %v2191_v23  ;;  %v2203_v32 = vsub.f32 %v4483_v9, %v2191_v23  ;;  %v2205_v21 = vsub.f32 %v4491_v34, %v2191_v23 }
 0x3cd   :  { %v2207_v17 = vsub.f32 %v4499_v18, %v2191_v23  ;;  %v2209_v60 = vsub.f32 %v4505_v38, %v2191_v23  ;;  %v2211_v31 = vsub.f32 %v4511_v61, %v2191_v23  ;;  %v2213_v25 = vsub.f32 %v4517_v35, %v2191_v23 }
 0x3ce   :  { %v2215_v15 = vmul.f32 1.442695, %v2199_v28  ;;  %v2219_v57 = vmul.f32 1.442695, %v2201_v24  ;;  %v2200_v59 = vsub.f32 %v4477_v0, %v2198_v63  ;;  %v2223_v11 = vmul.f32 1.442695, %v2203_v32 }
 0x3cf   :  { %v2202_v26 = vsub.f32 %v4481_v58, %v2198_v63  ;;  %v2227_v37 = vmul.f32 1.442695, %v2205_v21  ;;  %v2204_v9 = vsub.f32 %v4487_v33, %v2198_v63  ;;  %v2206_v18 = vsub.f32 %v4495_v29, %v2198_v63 }
 0x3d0   :  { %3291 = vpow2.f32 %v2215_v15  ;;  %v2208_v38 = vsub.f32 %v4502_v13, %v2198_v63  ;;  %v2210_v61 = vsub.f32 %v4508_v19, %v2198_v63  ;;  %v2231_v34 = vmul.f32 1.442695, %v2207_v17 }
 0x3d1   :  { %3293 = vpow2.f32 %v2219_v57  ;;  %v2212_v23 = vsub.f32 %v4514_v36, %v2198_v63  ;;  %v2214_v24 = vsub.f32 %v4520_v27, %v2198_v63  ;;  %v2235_v28 = vmul.f32 1.442695, %v2209_v60 }
 0x3d2   :  { %3295 = vpow2.f32 %v2223_v11  ;;  %v2217_v32 = vmul.f32 1.442695, %v2200_v59  ;;  %v2221_v15 = vmul.f32 1.442695, %v2202_v26  ;;  %v2239_v21 = vmul.f32 1.442695, %v2211_v31 }
 0x3d3   :  { %3297 = vpow2.f32 %v2227_v37  ;;  %v2225_v57 = vmul.f32 1.442695, %v2204_v9  ;;  %v2243_v35 = vmul.f32 1.442695, %v2213_v25  ;;  %v2229_v13 = vmul.f32 1.442695, %v2206_v18 }
 0x3d4   :  { %3299 = vpow2.f32 %v2231_v34  ;;  %v2233_v36 = vmul.f32 1.442695, %v2208_v38  ;;  %v2237_v60 = vmul.f32 1.442695, %v2210_v61  ;;  %v2241_v34 = vmul.f32 1.442695, %v2212_v23 }
 0x3d5   :  { %3301 = vpow2.f32 %v2235_v28  ;;  %v2245_v37 = vmul.f32 1.442695, %v2214_v24 }
 0x3d6   :  { %3303 = vpow2.f32 %v2217_v32 }
 0x3d7   :  { %3305 = vpow2.f32 %v2221_v15 }
 0x3d8   :  { %3307 = vpow2.f32 %v2239_v21 }
 0x3d9   :  { %3309 = vpow2.f32 %v2225_v57 }
 0x3da   :  { %v3292_v29 = vpop.eup %3291  ;;  %3311 = vpow2.f32 %v2243_v35 }
 0x3db   :  { %v3294_v17 = vpop.eup %3293  ;;  %3313 = vpow2.f32 %v2229_v13 }
 0x3dc   :  { %v2247_v63 = vadd.f32 %v3294_v17, %v3292_v29  ;;  %v3296_v11 = vpop.eup %3295  ;;  %3315 = vpow2.f32 %v2233_v36 }
 0x3dd   :  { %v3298_v26 = vpop.eup %3297  ;;  %3317 = vpow2.f32 %v2237_v60 }
 0x3de   :  { %v2248_v59 = vadd.f32 %v3296_v11, %v2247_v63  ;;  %v3300_v31 = vpop.eup %3299  ;;  %3319 = vpow2.f32 %v2241_v34 }
 0x3df   :  { %v3302_v25 = vpop.eup %3301  ;;  %3321 = vpow2.f32 %v2245_v37 }
 0x3e0   :  { %v2249_v9 = vadd.f32 %v3298_v26, %v2248_v59  ;;  %v3304_v18 = vpop.eup %3303 }
 0x3e1   :  { %v3306_v32 = vpop.eup %3305 }
 0x3e2   :  { %v2250_v28 = vadd.f32 %v3300_v31, %v2249_v9  ;;  %v3308_v15 = vpop.eup %3307  ;;  %v2254_v35 = vadd.f32 %v3306_v32, %v3304_v18 }
 0x3e3   :  { %v3310_v21 = vpop.eup %3309 }
 0x3e4   :  { %v2251_v38 = vadd.f32 %v3302_v25, %v2250_v28  ;;  %v3312_v13 = vpop.eup %3311  ;;  %v2255_v57 = vadd.f32 %v3310_v21, %v2254_v35 }
 0x3e5   :  { %v3314_v63 = vpop.eup %3313 }
 0x3e6   :  { %v2252_v61 = vadd.f32 %v3308_v15, %v2251_v38  ;;  %v2256_v23 = vadd.f32 %v3314_v63, %v2255_v57  ;;  %v3316_v27 = vpop.eup %3315  ;;  %v4811_v57 = vld [vmem:[#allocation7_spill] sm:$0xff] }
 0x3e7   :  { %v3318_v60 = vpop.eup %3317 }
 0x3e8   :  { %v2253_v36 = vadd.f32 %v3312_v13, %v2252_v61  ;;  %v2257_v59 = vadd.f32 %v3316_v27, %v2256_v23  ;;  %v3320_v19 = vpop.eup %3319 }
 0x3e9   :  { %v3322_v33 = vpop.eup %3321 }
 0x3ea   :  { %3323 = vrcp.f32 %v2253_v36  ;;  %v2258_v24 = vadd.f32 %v3318_v60, %v2257_v59  ;;  %v4812_v36 = vld [vmem:[#allocation8_spill] sm:$0xff] }
 0x3ec   :  { %v2259_v9 = vadd.f32 %v3320_v19, %v2258_v24 }
 0x3ee   :  { %v2260_v34 = vadd.f32 %v3322_v33, %v2259_v9 }
 0x3f0   :  { %3325 = vrcp.f32 %v2260_v34 }
 0x3f4   :  { %v3324_v28 = vpop.eup %3323 }
 0x3f5   :  { %v2263_v58 = vmul.f32 %v3324_v28, %v3292_v29  ;;  %v2265_v10 = vmul.f32 %v3324_v28, %v3294_v17  ;;  %v2267_v37 = vmul.f32 %v3324_v28, %v3296_v11  ;;  %v2269_v0 = vmul.f32 %v3324_v28, %v3298_v26 }
 0x3f6   :  { %v2271_v38 = vmul.f32 %v3324_v28, %v3300_v31  ;;  %v2273_v35 = vmul.f32 %v3324_v28, %v3302_v25  ;;  %v2275_v14 = vmul.f32 %v3324_v28, %v3308_v15  ;;  %v2277_v61 = vmul.f32 %v3324_v28, %v3312_v13  ;;  %v4814_v25 = vld [vmem:[#allocation9_spill] sm:$0xff]  ;;  %v4815_v13 = vld [vmem:[#allocation10_spill] sm:$0xff] }
 0x3f7   :  { %v2279_v12 = vmul.f32 %v2263_v58, %v4811_v57  ;;  %v2281_v23 = vmul.f32 %v2265_v10, %v4812_v36  ;;  %v2283_v59 = vmul.f32 %v2267_v37, %v4813_v2  ;;  %v4816_v58 = vld [vmem:[#allocation13_spill] sm:$0xff]  ;;  %v4817_v10 = vld [vmem:[#allocation12_spill] sm:$0xff] }
 0x3f8   :  { %v2285_v57 = vmul.f32 %v2269_v0, %v4816_v58 }
 0x3f9   :  { %v2295_v22 = vadd.f32 %v2281_v23, %v2279_v12  ;;  %v4818_v12 = vld [vmem:[#allocation15_spill] sm:$0xff] }
 0x3fa   :  { %v3326_v16 = vpop.eup %3325 }
 0x3fb   :  { %v2296_v24 = vadd.f32 %v2295_v22, %v2283_v59  ;;  %v2264_v9 = vmul.f32 %v3326_v16, %v3304_v18  ;;  %v2266_v34 = vmul.f32 %v3326_v16, %v3306_v32  ;;  %v2268_v8 = vmul.f32 %v3326_v16, %v3310_v21  ;;  %v4819_v18 = vld [vmem:[#allocation14_spill] sm:$0xff] }
 0x3fc   :  { %v2270_v29 = vmul.f32 %v3326_v16, %v3314_v63  ;;  %v2272_v17 = vmul.f32 %v3326_v16, %v3316_v27  ;;  %v2274_v11 = vmul.f32 %v3326_v16, %v3318_v60  ;;  %v2276_v26 = vmul.f32 %v3326_v16, %v3320_v19  ;;  %v4820_v19 = vld [vmem:[#allocation16_spill] sm:$0xff] }
 0x3fd   :  { %v2278_v31 = vmul.f32 %v3326_v16, %v3322_v33  ;;  %v2280_v15 = vmul.f32 %v2264_v9, %v4814_v25  ;;  %v2282_v28 = vmul.f32 %v2266_v34, %v4815_v13  ;;  %v2284_v36 = vmul.f32 %v2268_v8, %v4817_v10  ;;  %v4821_v9 = vld [vmem:[#allocation19_spill] sm:$0xff]  ;;  %v4822_v8 = vld [vmem:[#allocation21_spill] sm:$0xff] }
 0x3fe   :  { %v2287_v22 = vmul.f32 %v2271_v38, %v4818_v12  ;;  %v2297_v23 = vadd.f32 %v2296_v24, %v2285_v57  ;;  %v2286_v32 = vmul.f32 %v2270_v29, %v4819_v18  ;;  %v2289_v27 = vmul.f32 %v2273_v35, %v4303_v30  ;;  %v4823_v38 = vld [vmem:[#allocation20_spill] sm:$0xff] }
 0x3ff   :  { %v2302_v37 = vadd.f32 %v2282_v28, %v2280_v15  ;;  %v2288_v16 = vmul.f32 %v2272_v17, %v4820_v19  ;;  %v2291_v60 = vmul.f32 %v2275_v14, %v4319_v20  ;;  %v2290_v0 = vmul.f32 %v2274_v11, %v4821_v9 }
 0x400   :  { %v2298_v63 = vadd.f32 %v2297_v23, %v2287_v22  ;;  %v2293_v15 = vmul.f32 %v2277_v61, %v4822_v8  ;;  %v2292_v57 = vmul.f32 %v2276_v26, %v4823_v38  ;;  %v3379_v61 = vld [vmem:[%s4683_s3] ss:$8 sps:$4 sm:$0xff]   ;;  %v3380_v26 = vld [vmem:[%s4683_s3 + $0x14] ss:$8 sps:$4 sm:$0xff]  }
 0x401   :  { %v2303_v21 = vadd.f32 %v2302_v37, %v2284_v36  ;;  %v4824_v36 = vld [vmem:[#allocation22_spill] sm:$0xff] }
 0x402   :  { %v2299_v59 = vadd.f32 %v2298_v63, %v2289_v27  ;;  %v2294_v35 = vmul.f32 %v2278_v31, %v4824_v36  ;;  %v3381_v31 = vld [vmem:[%s4683_s3 + $0x10] ss:$8 sps:$4 sm:$0xff]  }
 0x403   :  { %v2304_v33 = vadd.f32 %v2303_v21, %v2286_v32  ;;  %v3382_v32 = vld [vmem:[%s4683_s3 + $0x24] ss:$8 sps:$4 sm:$0xff]   ;;  %v3383_v21 = vld [vmem:[%s4683_s3 + $0x20] ss:$8 sps:$4 sm:$0xff]   ;;  %v4828_v27 = vld [vmem:[#allocation25_spill] sm:$0xff] }
 0x404   :  { %v2300_v28 = vadd.f32 %v2299_v59, %v2291_v60  ;;  %v4830_v60 = vld [vmem:[#allocation27_spill] sm:$0xff] }
 0x405   :  { %v2305_v34 = vadd.f32 %v2304_v33, %v2288_v16  ;;  %v4829_v16 = vld [vmem:[#allocation26_spill] sm:$0xff] }
 0x406   :  { %v4554_v29 = vadd.f32 %v2300_v28, %v2293_v15 }
 0x407   :  { %v2306_v24 = vadd.f32 %v2305_v34, %v2290_v0  ;;  %v4831_v0 = vld [vmem:[#allocation28_spill] sm:$0xff] }
 0x408   :  { %v2309_v14 = vmul.f32 %v4554_v29, %v4554_v29 }
 0x409   :  { %v2307_v37 = vadd.f32 %v2306_v24, %v2292_v57  ;;  %v4832_v24 = vld [vmem:[#allocation2_spill] sm:$0xff] }
 0x40a   :  { %v2311_v23 = vpack.c.bf16 %v2309_v14, %v2309_v14 }
 0x40b   :  { %v4557_v22 = vadd.f32 %v2307_v37, %v2294_v35  ;;  %v4833_v35 = vld [vmem:[#allocation29_spill] sm:$0xff] }
 0x40d   :  { %v2310_v17 = vmul.f32 %v4557_v22, %v4557_v22 }
 0x40f   :  { %v2312_v11 = vpack.c.bf16 %v2310_v17, %v2310_v17  ;;  %v4835_v17 = vld [vmem:[#allocation6_spill] sm:$0xff] }
 0x411   :  { %2345 = vmatprep.mubr.bf16.mxu0 %v2312_v11 }
 0x412   :  { %2346 = vmatmul.mubr.bf16.vlgmr.msra.gmra.mrb[20].mxu0 %v2311_v23 }
 0x413   :  { %2652 = vmatpush1.bf16.msra.mxu0 %v3379_v61 }
 0x414   :  { %2653 = vmatprep.subr.bf16.mxu0 %v3380_v26  ;;  %v4836_v26 = vld [vmem:[#allocation4_spill] sm:$0xff] }
 0x417   :  { %2654 = vmatpush1.bf16.msra.mxu0 %v3381_v31 }
 0x418   :  { %2655 = vmatprep.subr.bf16.mxu0 %v3382_v32  ;;  %v4837_v32 = vld [vmem:[#allocation5_spill] sm:$0xff] }
 0x41b   :  { %2656 = vmatpush1.bf16.msra.mxu0 %v3383_v21 }
 0x41c   :  { %2657 = vmatprep.subr.bf16.mxu0 %v4060_v39  ;;  %v4825_v39 = vld [vmem:[#allocation3_spill] sm:$0xff] }
 0x41f   :  { %2658 = vmatpush1.bf16.msra.mxu0 %v4067_v40 }
 0x420   :  { %2659 = vmatprep.subr.bf16.mxu0 %v4074_v41 }
 0x423   :  { %2660 = vmatpush1.bf16.msra.mxu0 %v4080_v42 }
 0x424   :  { %2661 = vmatprep.subr.bf16.mxu0 %v4086_v43 }
 0x427   :  { %2662 = vmatpush1.bf16.msra.mxu0 %v4095_v44 }
 0x428   :  { %2663 = vmatprep.subr.bf16.mxu0 %v4102_v45 }
 0x42b   :  { %2664 = vmatpush1.bf16.msra.mxu0 %v4109_v46 }
 0x42c   :  { %2665 = vmatprep.subr.bf16.mxu0 %v4116_v47 }
 0x42f   :  { %2666 = vmatpush1.bf16.msra.mxu0 %v4123_v48 }
 0x430   :  { %2667 = vmatprep.subr.bf16.mxu0 %v4130_v49 }
 0x433   :  { %2668 = vmatpush1.bf16.msra.mxu0 %v4137_v50 }
 0x434   :  { %2669 = vmatprep.subr.bf16.mxu0 %v4144_v51 }
 0x437   :  { %2670 = vmatpush1.bf16.msra.mxu0 %v4151_v52 }
 0x438   :  { %2671 = vmatprep.subr.bf16.mxu0 %v4158_v53 }
 0x43b   :  { %2672 = vmatpush1.bf16.msra.mxu0 %v4165_v54 }
 0x43c   :  { %2673 = vmatprep.subr.bf16.mxu0 %v4172_v55 }
 0x43f   :  { %2674 = vmatpush1.bf16.msra.mxu0 %v4182_v56 }
 0x440   :  { %2675 = vmatprep.subr.bf16.mxu0 %v4197_v62 }
 0x443   :  { %2676 = vmatpush1.bf16.msra.mxu0 %v4202_v1 }
 0x444   :  { %2677 = vmatprep.subr.bf16.mxu0 %v4211_v3 }
 0x447   :  { %2678 = vmatpush1.bf16.msra.mxu0 %v4216_v4  ;;  %v4826_v4 = vld [vmem:[#allocation23_spill] sm:$0xff] }
 0x448   :  { %2679 = vmatprep.subr.bf16.mxu0 %v4225_v5 }
 0x44b   :  { %2680 = vmatpush1.bf16.msra.mxu0 %v4230_v6  ;;  %v4827_v6 = vld [vmem:[#allocation24_spill] sm:$0xff] }
 0x44c   :  { %2681 = vmatprep.subr.bf16.mxu0 %v4235_v7 }
 0x44f   :  { %2682 = vmatpush1.bf16.msra.mxu0 %v4825_v39  ;;  %v4838_v39 = vld [vmem:[#allocation31_spill] sm:$0xff] }
 0x4e5   :  { %v2347_v40 = vpop.f32.mrb[20].mxu0 }
 0x4e6   :  { %v2354_v41 = vadd.f32 1.0, %v2347_v40  ;;  %v2360_v42 = vadd.f32 1e-09, %v2347_v40  ;;  %v2349_v43 = vpop.f32.mrb[21].mxu0 }
 0x4e7   :  { %v2355_v44 = vadd.f32 1.0, %v2349_v43  ;;  %v2351_v45 = vpop.f32.mrb[22].mxu0  ;;  %v2361_v46 = vadd.f32 1e-09, %v2349_v43 }
 0x4e8   :  { %3327 = vrcp.f32 %v2354_v41  ;;  %v2352_v47 = vpop.f32.mrb[23].mxu0  ;;  %v4839_v41 = vld [vmem:[#allocation32_spill] sm:$0xff]  ;;  %v4840_v45 = vld [vmem:[#allocation17_spill] sm:$0xff] }
 0x4e9   :  { %3329 = vrsqrt.f32 %v2360_v42  ;;  %v4841_v47 = vld [vmem:[#allocation18_spill] sm:$0xff] }
 0x4ea   :  { %3331 = vrcp.f32 %v2355_v44 }
 0x4eb   :  { %3333 = vrsqrt.f32 %v2361_v46 }
 0x4f2   :  { %v3328_v48 = vpop.eup %3327 }
 0x4f3   :  { %v3330_v49 = vpop.eup %3329  ;;  %v2358_v50 = vmul.f32 %v3328_v48, %v2347_v40 }
 0x4f4   :  { %v3332_v51 = vpop.eup %3331 }
 0x4f5   :  { %v2364_v52 = vmul.f32 %v3330_v49, %v2358_v50  ;;  %v2359_v53 = vmul.f32 %v3332_v51, %v2349_v43  ;;  %v3334_v54 = vpop.eup %3333  ;;  %v4842_v51 = vld [vmem:[#allocation33_spill] sm:$0xff] }
 0x4f7   :  { %v2366_v55 = vmul.f32 %v2364_v52, %v4554_v29  ;;  %v2365_v56 = vmul.f32 %v3334_v54, %v2359_v53  ;;  %v4843_v54 = vld [vmem:[#allocation34_spill] sm:$0xff] }
 0x4f9   :  { %v2368_v62 = vpack.c.bf16 %v2366_v55, %v2366_v55  ;;  %v2367_v1 = vmul.f32 %v2365_v56, %v4557_v22  ;;  %v4834_v22 = vld [vmem:[#allocation30_spill] sm:$0xff] }
 0x4fb   :  { %v2369_v3 = vpack.c.bf16 %v2367_v1, %v2367_v1  ;;  %v2370_v5 = vmul.bf16 %v2368_v62, %v4826_v4  ;;  %v2372_v7 = vmul.bf16 %v2368_v62, %v4827_v6  ;;  %v2374_v29 = vmul.bf16 %v2368_v62, %v4832_v24  ;;  %v4844_v1 = vld [vmem:[#allocation35_spill] sm:$0xff] }
 0x4fc   :  { %v2376_v37 = vmul.bf16 %v2368_v62, %v4833_v35  ;;  %v2378_v31 = vmul.bf16 %v2368_v62, %v4836_v26  ;;  %v2380_v21 = vmul.bf16 %v2368_v62, %v4837_v32  ;;  %v2382_v46 = vmul.bf16 %v2368_v62, %v4840_v45  ;;  %v4854_v45 = vld [vmem:[#allocation45_spill] sm:$0xff] }
 0x4fd   :  { %v2371_v63 = vmul.bf16 %v2369_v3, %v4828_v27  ;;  %v2373_v33 = vmul.bf16 %v2369_v3, %v4829_v16  ;;  %v2375_v59 = vmul.bf16 %v2369_v3, %v4830_v60  ;;  %v2377_v34 = vmul.bf16 %v2369_v3, %v4831_v0  ;;  %v4846_v27 = vld [vmem:[#allocation37_spill] sm:$0xff]  ;;  %v4847_v16 = vld [vmem:[#allocation38_spill] sm:$0xff]  ;;  %v4848_v0 = vld [vmem:[#allocation39_spill] sm:$0xff] }
 0x4fe   :  { %v2888_v28 = vcombine.low %v2370_v5, %v2372_v7  ;;  %v2379_v14 = vmul.bf16 %v2369_v3, %v4834_v22  ;;  %v2381_v11 = vmul.bf16 %v2369_v3, %v4835_v17  ;;  %v2890_v23 = vcombine.low %v2374_v29, %v2376_v37  ;;  %v4845_v5 = vld [vmem:[#allocation36_spill] sm:$0xff]  ;;  %v4850_v22 = vld [vmem:[#allocation41_spill] sm:$0xff] }
 0x4ff   :  { %v2889_v15 = vcombine.low %v2371_v63, %v2373_v33  ;;  %v2891_v57 = vcombine.low %v2375_v59, %v2377_v34  ;;  %v2383_v40 = vmul.bf16 %v2369_v3, %v4838_v39  ;;  %v2385_v42 = vmul.bf16 %v2369_v3, %v4839_v41 }
 0x500   :  { %v2893_v61 = vcombine.low %v2379_v14, %v2381_v11  ;;  %v2892_v43 = vcombine.low %v2378_v31, %v2380_v21  ;;  %v2384_v48 = vmul.bf16 %v2368_v62, %v4841_v47  ;;  %v4851_v11 = vld [vmem:[#allocation42_spill] sm:$0xff]  ;;  %v4852_v31 = vld [vmem:[#allocation43_spill] sm:$0xff] }
 0x501   :  { %2466 = vmatprep.mubr.bf16.mxu1 %v2889_v15  ;;  %v2895_v44 = vcombine.low %v2383_v40, %v2385_v42  ;;  %v4853_v40 = vld [vmem:[#allocation44_spill] sm:$0xff] }
 0x502   :  { %2467 = vmatmul.mubr.bf16.vlgmr.msra.gmra.mrb[32].mxu1 %v2888_v28  ;;  %v2894_v49 = vcombine.low %v2382_v46, %v2384_v48  ;;  %v4855_v48 = vld [vmem:[#allocation46_spill] sm:$0xff] }
 0x503   :  { %2476 = vmatprep.mubr.bf16.mxu1 %v2891_v57  ;;  %v4849_v57 = vld [vmem:[#allocation40_spill] sm:$0xff] }
 0x50a   :  { %2477 = vmatmul.mubr.bf16.gmra.mrb[36].mxu1 %v2890_v23 }
 0x50b   :  { %2486 = vmatprep.mubr.bf16.mxu1 %v2893_v61 }
 0x512   :  { %2487 = vmatmul.mubr.bf16.gmra.mrb[40].mxu1 %v2892_v43 }
 0x513   :  { %2496 = vmatprep.mubr.bf16.mxu1 %v2895_v44 }
 0x51a   :  { %2497 = vmatmul.mubr.bf16.gmra.mrb[44].mxu1 %v2894_v49 }
 0x5d5   :  { %v2468_v50 = vpop.f32.mrb[32].mxu1 }
 0x5d6   :  { %v2507_v52 = vadd.f32 %v2468_v50, %v4842_v51  ;;  %v2470_v53 = vpop.f32.mrb[33].mxu1 }
 0x5d7   :  { %v4624_v55 = vadd.f32 %v2470_v53, %v4843_v54  ;;  %v2472_v56 = vpop.f32.mrb[34].mxu1  ;;  %v4856_v53 = vld [vmem:[#allocation47_spill] sm:$0xff] }
 0x5d8   :  { %v2509_v3 = vadd.f32 %v2472_v56, %v4844_v1  ;;  %v2474_v4 = vpop.f32.mrb[35].mxu1 }
 0x5d9   :  { %v4628_v6 = vadd.f32 %v2474_v4, %v4845_v5  ;;  %v4857_v4 = vld [vmem:[#allocation48_spill] sm:$0xff] }
 0x5dd   :  { %v2478_v7 = vpop.f32.mrb[36].mxu1 }
 0x5de   :  { %v2511_v63 = vadd.f32 %v2478_v7, %v4846_v27  ;;  %v2480_v62 = vpop.f32.mrb[37].mxu1 }
 0x5df   :  { %v4632_v33 = vadd.f32 %v2480_v62, %v4847_v16  ;;  %v2482_v60 = vpop.f32.mrb[38].mxu1 }
 0x5e0   :  { %v2523_v59 = vmax.f32 %v2507_v52, %v2511_v63  ;;  %v2513_v34 = vadd.f32 %v2482_v60, %v4848_v0  ;;  %v2484_v15 = vpop.f32.mrb[39].mxu1 }
 0x5e1   :  { %v2530_v28 = vmax.f32 %v4624_v55, %v4632_v33  ;;  %v4638_v24 = vadd.f32 %v2484_v15, %v4849_v57 }
 0x5e2   :  { %v2524_v29 = vmax.f32 %v2509_v3, %v2513_v34 }
 0x5e3   :  { %v2531_v35 = vmax.f32 %v4628_v6, %v4638_v24 }
 0x5e5   :  { %v2488_v37 = vpop.f32.mrb[40].mxu1 }
 0x5e6   :  { %v2515_v14 = vadd.f32 %v2488_v37, %v4850_v22  ;;  %v2490_v17 = vpop.f32.mrb[41].mxu1 }
 0x5e7   :  { %v4644_v23 = vadd.f32 %v2490_v17, %v4851_v11  ;;  %v2492_v61 = vpop.f32.mrb[42].mxu1 }
 0x5e8   :  { %v2525_v26 = vmax.f32 %v2523_v59, %v2515_v14  ;;  %v2517_v32 = vadd.f32 %v2492_v61, %v4852_v31  ;;  %v2494_v21 = vpop.f32.mrb[43].mxu1 }
 0x5e9   :  { %v2532_v39 = vmax.f32 %v2530_v28, %v4644_v23  ;;  %v2518_v41 = vadd.f32 %v2494_v21, %v4853_v40 }
 0x5ea   :  { %v2526_v42 = vmax.f32 %v2524_v29, %v2517_v32 }
 0x5eb   :  { %v2533_v43 = vmax.f32 %v2531_v35, %v2518_v41 }
 0x5ed   :  { %v2498_v44 = vpop.f32.mrb[44].mxu1 }
 0x5ee   :  { %v2519_v46 = vadd.f32 %v2498_v44, %v4854_v45  ;;  %v2500_v47 = vpop.f32.mrb[45].mxu1 }
 0x5ef   :  { %v2520_v49 = vadd.f32 %v2500_v47, %v4855_v48  ;;  %v2502_v50 = vpop.f32.mrb[46].mxu1 }
 0x5f0   :  { %v2527_v51 = vmax.f32 %v2525_v26, %v2519_v46  ;;  %v2521_v54 = vadd.f32 %v2502_v50, %v4856_v53  ;;  %v2504_v56 = vpop.f32.mrb[47].mxu1 }
 0x5f1   :  { %v2534_v1 = vmax.f32 %v2532_v39, %v2520_v49  ;;  %v2522_v5 = vadd.f32 %v2504_v56, %v4857_v4 }
 0x5f2   :  { %v2528_v7 = vmax.f32 %v2526_v42, %v2521_v54 }
 0x5f3   :  { %v2535_v27 = vmax.f32 %v2533_v43, %v2522_v5 }
 0x5f4   :  { %v2529_v62 = vmax.f32 %v2527_v51, %v2528_v7 }
 0x5f5   :  { %v2536_v16 = vmax.f32 %v2534_v1, %v2535_v27 }
 0x5f6   :  { %v2537_v60 = vsub.f32 %v2507_v52, %v2529_v62  ;;  %v2539_v59 = vsub.f32 %v2509_v3, %v2529_v62  ;;  %v2541_v0 = vsub.f32 %v2511_v63, %v2529_v62  ;;  %v2543_v15 = vsub.f32 %v2513_v34, %v2529_v62 }
 0x5f7   :  { %v2545_v28 = vsub.f32 %v2515_v14, %v2529_v62  ;;  %v2547_v57 = vsub.f32 %v2517_v32, %v2529_v62  ;;  %v2549_v29 = vsub.f32 %v2519_v46, %v2529_v62  ;;  %v2551_v35 = vsub.f32 %v2521_v54, %v2529_v62 }
 0x5f8   :  { %v2553_v37 = vmul.f32 1.442695, %v2537_v60  ;;  %v2557_v22 = vmul.f32 1.442695, %v2539_v59  ;;  %v2538_v17 = vsub.f32 %v4624_v55, %v2536_v16  ;;  %v2561_v11 = vmul.f32 1.442695, %v2541_v0 }
 0x5f9   :  { %v2540_v61 = vsub.f32 %v4628_v6, %v2536_v16  ;;  %v2565_v26 = vmul.f32 1.442695, %v2543_v15  ;;  %v2542_v31 = vsub.f32 %v4632_v33, %v2536_v16  ;;  %v2544_v52 = vsub.f32 %v4638_v24, %v2536_v16 }
 0x5fa   :  { %3335 = vpow2.f32 %v2553_v37  ;;  %v2546_v3 = vsub.f32 %v4644_v23, %v2536_v16  ;;  %v2548_v63 = vsub.f32 %v2518_v41, %v2536_v16  ;;  %v2569_v34 = vmul.f32 1.442695, %v2545_v28 }
 0x5fb   :  { %3337 = vpow2.f32 %v2557_v22  ;;  %v2550_v14 = vsub.f32 %v2520_v49, %v2536_v16  ;;  %v2552_v32 = vsub.f32 %v2522_v5, %v2536_v16  ;;  %v2573_v21 = vmul.f32 1.442695, %v2547_v57 }
 0x5fc   :  { %3339 = vpow2.f32 %v2561_v11  ;;  %v2555_v39 = vmul.f32 1.442695, %v2538_v17  ;;  %v2559_v55 = vmul.f32 1.442695, %v2540_v61  ;;  %v2577_v6 = vmul.f32 1.442695, %v2549_v29 }
 0x5fd   :  { %3341 = vpow2.f32 %v2565_v26  ;;  %v2563_v40 = vmul.f32 1.442695, %v2542_v31  ;;  %v2581_v42 = vmul.f32 1.442695, %v2551_v35  ;;  %v2567_v33 = vmul.f32 1.442695, %v2544_v52 }
 0x5fe   :  { %3343 = vpow2.f32 %v2569_v34  ;;  %v2571_v41 = vmul.f32 1.442695, %v2546_v3  ;;  %v2575_v45 = vmul.f32 1.442695, %v2548_v63  ;;  %v2579_v48 = vmul.f32 1.442695, %v2550_v14 }
 0x5ff   :  { %3345 = vpow2.f32 %v2573_v21  ;;  %v2583_v53 = vmul.f32 1.442695, %v2552_v32  ;;  %v4858_v21 = vld [vmem:[#allocation7_spill] sm:$0xff] }
 0x600   :  { %3347 = vpow2.f32 %v2555_v39 }
 0x601   :  { %3349 = vpow2.f32 %v2559_v55  ;;  %v4859_v55 = vld [vmem:[#allocation8_spill] sm:$0xff] }
 0x602   :  { %3351 = vpow2.f32 %v2577_v6 }
 0x603   :  { %3353 = vpow2.f32 %v2563_v40 }
 0x604   :  { %v3336_v24 = vpop.eup %3335  ;;  %3355 = vpow2.f32 %v2581_v42 }
 0x605   :  { %v3338_v23 = vpop.eup %3337  ;;  %3357 = vpow2.f32 %v2567_v33 }
 0x606   :  { %v2585_v43 = vadd.f32 %v3338_v23, %v3336_v24  ;;  %v3340_v44 = vpop.eup %3339  ;;  %3359 = vpow2.f32 %v2571_v41 }
 0x607   :  { %v3342_v47 = vpop.eup %3341  ;;  %3361 = vpow2.f32 %v2575_v45 }
 0x608   :  { %v2586_v46 = vadd.f32 %v3340_v44, %v2585_v43  ;;  %v3344_v49 = vpop.eup %3343  ;;  %3363 = vpow2.f32 %v2579_v48 }
 0x609   :  { %v3346_v51 = vpop.eup %3345  ;;  %3365 = vpow2.f32 %v2583_v53 }
 0x60a   :  { %v2587_v50 = vadd.f32 %v3342_v47, %v2586_v46  ;;  %v3348_v54 = vpop.eup %3347 }
 0x60b   :  { %v3350_v1 = vpop.eup %3349 }
 0x60c   :  { %v2588_v56 = vadd.f32 %v3344_v49, %v2587_v50  ;;  %v3352_v4 = vpop.eup %3351  ;;  %v2592_v7 = vadd.f32 %v3350_v1, %v3348_v54 }
 0x60d   :  { %v3354_v27 = vpop.eup %3353 }
 0x60e   :  { %v2589_v5 = vadd.f32 %v3346_v51, %v2588_v56  ;;  %v3356_v62 = vpop.eup %3355  ;;  %v2593_v60 = vadd.f32 %v3354_v27, %v2592_v7 }
 0x60f   :  { %v3358_v59 = vpop.eup %3357 }
 0x610   :  { %v2590_v16 = vadd.f32 %v3352_v4, %v2589_v5  ;;  %v2594_v15 = vadd.f32 %v3358_v59, %v2593_v60  ;;  %v3360_v28 = vpop.eup %3359 }
 0x611   :  { %v3362_v29 = vpop.eup %3361 }
 0x612   :  { %v2591_v0 = vadd.f32 %v3356_v62, %v2590_v16  ;;  %v2595_v57 = vadd.f32 %v3360_v28, %v2594_v15  ;;  %v3364_v37 = vpop.eup %3363 }
 0x613   :  { %v3366_v17 = vpop.eup %3365 }
 0x614   :  { %3367 = vrcp.f32 %v2591_v0  ;;  %v2596_v35 = vadd.f32 %v3362_v29, %v2595_v57 }
 0x616   :  { %v2597_v22 = vadd.f32 %v3364_v37, %v2596_v35 }
 0x618   :  { %v2598_v11 = vadd.f32 %v3366_v17, %v2597_v22 }
 0x61a   :  { %3369 = vrcp.f32 %v2598_v11 }
 0x61e   :  { %v3368_v61 = vpop.eup %3367 }
 0x61f   :  { %v2601_v26 = vmul.f32 %v3368_v61, %v3336_v24  ;;  %v2603_v31 = vmul.f32 %v3368_v61, %v3338_v23  ;;  %v2605_v52 = vmul.f32 %v3368_v61, %v3340_v44  ;;  %v2607_v3 = vmul.f32 %v3368_v61, %v3342_v47 }
 0x620   :  { %v2609_v63 = vmul.f32 %v3368_v61, %v3344_v49  ;;  %v2611_v34 = vmul.f32 %v3368_v61, %v3346_v51  ;;  %v2613_v14 = vmul.f32 %v3368_v61, %v3352_v4  ;;  %v2615_v32 = vmul.f32 %v3368_v61, %v3356_v62 }
 0x621   :  { %v2617_v39 = vmul.f32 %v2601_v26, %v4858_v21  ;;  %v2619_v6 = vmul.f32 %v2603_v31, %v4859_v55  ;;  %v2621_v40 = vmul.f32 %v2605_v52, %v4813_v2  ;;  %v2623_v51 = vmul.f32 %v2607_v3, %v4816_v58 }
 0x622   :  { %v2625_v56 = vmul.f32 %v2609_v63, %v4818_v12  ;;  %v2627_v5 = vmul.f32 %v2611_v34, %v4303_v30 }
 0x623   :  { %v2633_v42 = vadd.f32 %v2619_v6, %v2617_v39 }
 0x624   :  { %v3370_v41 = vpop.eup %3369 }
 0x625   :  { %v2634_v33 = vadd.f32 %v2633_v42, %v2621_v40  ;;  %v2602_v43 = vmul.f32 %v3370_v41, %v3348_v54  ;;  %v2604_v45 = vmul.f32 %v3370_v41, %v3350_v1  ;;  %v2606_v46 = vmul.f32 %v3370_v41, %v3354_v27 }
 0x626   :  { %v2608_v24 = vmul.f32 %v3370_v41, %v3358_v59  ;;  %v2610_v23 = vmul.f32 %v3370_v41, %v3360_v28  ;;  %v2612_v44 = vmul.f32 %v3370_v41, %v3362_v29  ;;  %v2614_v47 = vmul.f32 %v3370_v41, %v3364_v37 }
 0x627   :  { %v2616_v48 = vmul.f32 %v3370_v41, %v3366_v17  ;;  %v2618_v49 = vmul.f32 %v2602_v43, %v4814_v25  ;;  %v2620_v50 = vmul.f32 %v2604_v45, %v4815_v13  ;;  %v2622_v53 = vmul.f32 %v2606_v46, %v4817_v10 }
 0x628   :  { %v2635_v4 = vadd.f32 %v2634_v33, %v2623_v51  ;;  %v2624_v54 = vmul.f32 %v2608_v24, %v4819_v18  ;;  %v2626_v27 = vmul.f32 %v2610_v23, %v4820_v19  ;;  %v2629_v25 = vmul.f32 %v2613_v14, %v4319_v20 }
 0x629   :  { %v2640_v2 = vadd.f32 %v2620_v50, %v2618_v49  ;;  %v2628_v58 = vmul.f32 %v2612_v44, %v4821_v9  ;;  %v2631_v10 = vmul.f32 %v2615_v32, %v4822_v8  ;;  %v2630_v12 = vmul.f32 %v2614_v47, %v4823_v38 }
 0x62a   :  { %v2636_v7 = vadd.f32 %v2635_v4, %v2625_v56  ;;  %v2632_v0 = vmul.f32 %v2616_v48, %v4824_v36 }
 0x62b   :  { %v2641_v1 = vadd.f32 %v2640_v2, %v2622_v53 }
 0x62c   :  { %v2637_v13 = vadd.f32 %v2636_v7, %v2627_v5 }
 0x62d   :  { %v2642_v62 = vadd.f32 %v2641_v1, %v2624_v54 }
 0x62e   :  { %v2638_v60 = vadd.f32 %v2637_v13, %v2629_v25 }
 0x62f   :  { %v2643_v16 = vadd.f32 %v2642_v62, %v2626_v27 }
 0x630   :  { %v2639_v18 = vadd.f32 %v2638_v60, %v2631_v10 }
 0x631   :  { %v2644_v59 = vadd.f32 %v2643_v16, %v2628_v58 }
 0x632   :  { %v2647_v28 = vmul.f32 %v2639_v18, %v2639_v18 }
 0x633   :  { %v2645_v30 = vadd.f32 %v2644_v59, %v2630_v12 }
 0x634   :  { %v2649_v29 = vpack.c.bf16 %v2647_v28, %v2647_v28 }
 0x635   :  { %v2646_v15 = vadd.f32 %v2645_v30, %v2632_v0 }
 0x637   :  { %v2648_v19 = vmul.f32 %v2646_v15, %v2646_v15 }
 0x639   :  { %v2650_v57 = vpack.c.bf16 %v2648_v19, %v2648_v19 }
 0x63b   :  { %2683 = vmatprep.mubr.bf16.mxu0 %v2650_v57 }
 0x63c   :  { %2684 = vmatmul.mubr.bf16.vlgmr.msra.gmra.mrb[24].mxu0 %v2649_v29 }
 0x70f   :  { %v2685_v20 = vpop.f32.mrb[24].mxu0 }
 0x710   :  { %v2692_v9 = vadd.f32 1.0, %v2685_v20  ;;  %v2698_v35 = vadd.f32 1e-09, %v2685_v20  ;;  %v2687_v37 = vpop.f32.mrb[25].mxu0 }
 0x711   :  { %v2693_v8 = vadd.f32 1.0, %v2687_v37  ;;  %v2689_v22 = vpop.f32.mrb[26].mxu0  ;;  %v2699_v38 = vadd.f32 1e-09, %v2687_v37 }
 0x712   :  { %3371 = vrcp.f32 %v2692_v9  ;;  %v2690_v17 = vpop.f32.mrb[27].mxu0 }
 0x713   :  { %3373 = vrsqrt.f32 %v2698_v35 }
 0x714   :  { %3375 = vrcp.f32 %v2693_v8 }
 0x715   :  { %3377 = vrsqrt.f32 %v2699_v38 }
 0x71c   :  { %v3372_v36 = vpop.eup %3371 }
 0x71d   :  { %v3374_v11 = vpop.eup %3373  ;;  %v2696_v61 = vmul.f32 %v3372_v36, %v2685_v20 }
 0x71e   :  { %v3376_v26 = vpop.eup %3375 }
 0x71f   :  { %v2702_v31 = vmul.f32 %v3374_v11, %v2696_v61  ;;  %v2697_v52 = vmul.f32 %v3376_v26, %v2687_v37  ;;  %v3378_v3 = vpop.eup %3377 }
 0x721   :  { %v2704_v63 = vmul.f32 %v2702_v31, %v2639_v18  ;;  %v2703_v34 = vmul.f32 %v3378_v3, %v2697_v52 }
 0x723   :  { %2706 = vst [vmem:[%s4684_s4] sm:$0xff] %v2704_v63  ;;  %v2705_v14 = vmul.f32 %v2703_v34, %v2646_v15 }
 0x725   :  { %2707 = vst [vmem:[%s4684_s4 + $0x8] sm:$0xff] %v2705_v14 }

</bundles_post_ra>
